<compile_context>
chip_gen: v6e
topology: v6e:2x2x1
jax: 0.10.0
libtpu: 0.0.40
codegen_flags: <defaults>
</compile_context>

<pallas_src>
import math
import functools

import jax
import jax.numpy as jnp
from jax.experimental import pallas as pl
from jax.experimental.pallas import tpu as pltpu


_PARAM_ORDER = ('wq', 'bq', 'wk', 'bk', 'wv', 'bv', 'wo', 'bo',
                'g1', 'be1', 'w1', 'b1', 'w2', 'b2', 'g2', 'be2')


# ----------------------------------------------------------------------------
# Kernel: one grid step == one full EncoderLayer applied to the (B*S, D) slab.
# The output block index is constant across the layer axis, so o_ref carries
# the activation from layer to layer entirely in VMEM.
# ----------------------------------------------------------------------------
def encoder_stack_kernel(src_ref, pe_ref,
                         wq_ref, bq_ref, wk_ref, bk_ref, wv_ref, bv_ref,
                         wo_ref, bo_ref, g1_ref, be1_ref,
                         w1_ref, b1_ref, w2_ref, b2_ref, g2_ref, be2_ref,
                         o_ref, *, batch, seq, n_heads):
    layer = pl.program_id(0)

    # Layer 0: fused positional-encoding add.
    # TODO(synk): nn.Dropout layers (p=0.1) are identity here (inference).
    @pl.when(layer == 0)
    def _():
        o_ref[...] = src_ref[...] + pe_ref[...]

    x = o_ref[...]                                   # (B*S, D) float32
    n, d_model = x.shape
    d_k = d_model // n_heads

    x_bf = x.astype(jnp.bfloat16)                    # bf16 MXU operands,
                                                     # f32 accumulation.
    # QKV projections (1/sqrt(d_k) pre-folded into W_q / b_q by the wrapper).
    q = jnp.dot(x_bf, wq_ref[0], preferred_element_type=jnp.float32) + bq_ref[0]
    k = jnp.dot(x_bf, wk_ref[0], preferred_element_type=jnp.float32) + bk_ref[0]
    v = jnp.dot(x_bf, wv_ref[0], preferred_element_type=jnp.float32) + bv_ref[0]

    q3 = q.reshape(batch, seq, d_model).astype(jnp.bfloat16)
    k3 = k.reshape(batch, seq, d_model).astype(jnp.bfloat16)
    v3 = v.reshape(batch, seq, d_model).astype(jnp.bfloat16)

    wo = wo_ref[0]                                   # (D, D) bf16
    attn = jnp.zeros((n, d_model), jnp.float32)
    # Multi-head attention: batched over batch with one-batch-dim einsums,
    # static unroll over heads.  Each head's context is projected by its
    # d_k-row slice of W_o and accumulated (no concatenate of head outputs).
    for h in range(n_heads):
        lo = h * d_k
        qh = q3[:, :, lo:lo + d_k]                   # (B, S, d_k) bf16
        kh = k3[:, :, lo:lo + d_k]
        vh = v3[:, :, lo:lo + d_k]
        s = jnp.einsum('bqd,bkd->bqk', qh, kh,
                       preferred_element_type=jnp.float32)        # (B, S, S)
        s = s - jnp.max(s, axis=-1, keepdims=True)
        p = jnp.exp(s)                                            # f32 (EUP)
        p = p * pl.reciprocal(jnp.sum(p, axis=-1, keepdims=True), approx=True)
        ctx = jnp.einsum('bqk,bkd->bqd', p.astype(jnp.bfloat16), vh,
                         preferred_element_type=jnp.float32)      # (B, S, d_k)
        attn = attn + jnp.dot(ctx.reshape(n, d_k).astype(jnp.bfloat16),
                              wo[lo:lo + d_k, :],
                              preferred_element_type=jnp.float32)
    attn = attn + bo_ref[0]

    def layer_norm(y, gamma, beta, eps=1e-5):
        mu = jnp.mean(y, axis=-1, keepdims=True)
        var = jnp.mean((y - mu) ** 2, axis=-1, keepdims=True)
        return (y - mu) * jax.lax.rsqrt(var + eps) * gamma + beta

    # Residual + norm1 (all elementwise math in f32).
    y = layer_norm(x + attn, g1_ref[0], be1_ref[0])

    # Position-wise feed-forward (dropout = identity).
    hid = jnp.dot(y.astype(jnp.bfloat16), w1_ref[0],
                  preferred_element_type=jnp.float32) + b1_ref[0]
    hid = jnp.maximum(hid, 0.0)                      # ReLU
    ff = jnp.dot(hid.astype(jnp.bfloat16), w2_ref[0],
                 preferred_element_type=jnp.float32) + b2_ref[0]

    # Residual + norm2; becomes next layer's input (stays resident in VMEM).
    o_ref[...] = layer_norm(y + ff, g2_ref[0], be2_ref[0])


# ----------------------------------------------------------------------------
# Positional encoding buffer (same formula as PyTorch PositionalEncoding).
# ----------------------------------------------------------------------------
def positional_encoding(seq_len, d_model):
    position = jnp.arange(seq_len, dtype=jnp.float32)[:, None]
    div_term = jnp.exp(jnp.arange(0, d_model, 2, dtype=jnp.float32)
                       * (-math.log(10000.0) / d_model))
    pe = jnp.zeros((seq_len, d_model), jnp.float32)
    pe = pe.at[:, 0::2].set(jnp.sin(position * div_term))
    pe = pe.at[:, 1::2].set(jnp.cos(position * div_term))
    return pe


# ----------------------------------------------------------------------------
# Deterministic synthetic params (shapes match the PyTorch module; Linear
# weights stored transposed, biases uniform like nn.Linear's default init).
# ----------------------------------------------------------------------------
def init_encoder_params(key, d_model, n_layers, d_ff):
    layer_params = []
    s_d = 1.0 / math.sqrt(d_model)
    s_f = 1.0 / math.sqrt(d_ff)

    def u(k, shape, s):
        return jax.random.uniform(k, shape, jnp.float32, -s, s)

    for _ in range(n_layers):
        key, *subs = jax.random.split(key, 13)
        kq, kbq, kk, kbk, kv, kbv, ko, kbo, k1, kb1, k2, kb2 = subs
        p = {
            'wq': u(kq, (d_model, d_model), s_d), 'bq': u(kbq, (1, d_model), s_d),
            'wk': u(kk, (d_model, d_model), s_d), 'bk': u(kbk, (1, d_model), s_d),
            'wv': u(kv, (d_model, d_model), s_d), 'bv': u(kbv, (1, d_model), s_d),
            'wo': u(ko, (d_model, d_model), s_d), 'bo': u(kbo, (1, d_model), s_d),
            'g1': jnp.ones((1, d_model), jnp.float32),
            'be1': jnp.zeros((1, d_model), jnp.float32),
            'w1': u(k1, (d_model, d_ff), s_d), 'b1': u(kb1, (1, d_ff), s_d),
            'w2': u(k2, (d_ff, d_model), s_f), 'b2': u(kb2, (1, d_model), s_f),
            'g2': jnp.ones((1, d_model), jnp.float32),
            'be2': jnp.zeros((1, d_model), jnp.float32),
        }
        layer_params.append(p)
    return layer_params


# ----------------------------------------------------------------------------
# Full Encoder forward: ONE pallas_call over all layers.
# ----------------------------------------------------------------------------
def encoder_forward(src, layer_params, n_heads):
    B, S, D = src.shape
    L = len(layer_params)
    F = layer_params[0]['w1'].shape[-1]
    d_k = D // n_heads
    scale = 1.0 / math.sqrt(d_k)
    N = B * S

    # Present activations to the kernel as a single lane-contiguous (B*S, D)
    # slab; reshape back after the call.
    pe = positional_encoding(S, D)
    pe2 = jnp.broadcast_to(pe[None, :, :], (B, S, D)).reshape(N, D)
    src2 = src.reshape(N, D)

    # Stack per-layer params along a leading layer axis (whole encoder in one
    # pallas_call, grid over layers, weights streamed layer-by-layer).
    stacked = {name: jnp.stack([p[name] for p in layer_params], axis=0)
               for name in _PARAM_ORDER}
    # Fold the 1/sqrt(d_k) attention scale into W_q / b_q at trace time.
    stacked['wq'] = stacked['wq'] * scale
    stacked['bq'] = stacked['bq'] * scale
    # bf16 matmul weights (halves weight VMEM; accumulation stays f32).
    for name in ('wq', 'wk', 'wv', 'wo', 'w1', 'w2'):
        stacked[name] = stacked[name].astype(jnp.bfloat16)
    ordered = [stacked[name] for name in _PARAM_ORDER]

    act_spec = pl.BlockSpec((N, D), lambda l: (0, 0))
    param_specs = [pl.BlockSpec((1,) + p.shape[1:], lambda l: (l, 0, 0))
                   for p in ordered]

    flops_per_layer = 8 * N * D * D + 4 * N * S * D + 4 * N * D * F
    cost = pl.CostEstimate(
        flops=L * flops_per_layer,
        transcendentals=L * (B * n_heads * S * S + 2 * N),
        bytes_accessed=int(3 * N * D * 4
                           + sum(p.size * p.dtype.itemsize for p in ordered)))

    out2 = pl.pallas_call(
        functools.partial(encoder_stack_kernel, batch=B, seq=S, n_heads=n_heads),
        out_shape=jax.ShapeDtypeStruct((N, D), jnp.float32),
        grid=(L,),
        in_specs=[act_spec, act_spec] + param_specs,
        out_specs=act_spec,
        # The layer axis is a true sequential dependency -> "arbitrary".
        # (For large B*S, add a leading "parallel" axis over row tiles so
        #  v7x's second TensorCore gets work.)
        compiler_params=pltpu.CompilerParams(
            dimension_semantics=("arbitrary",)),
        cost_estimate=cost,
    )(src2, pe2, *ordered)
    return out2.reshape(B, S, D)


if __name__ == "__main__":
    d_model, n_layers, n_heads, d_ff = 32, 2, 4, 64
    batch, seq = 2, 8

    key = jax.random.PRNGKey(0)
    key, k_src, k_params = jax.random.split(key, 3)

    src = jax.random.normal(k_src, (batch, seq, d_model), jnp.float32)
    layer_params = init_encoder_params(k_params, d_model, n_layers, d_ff)

    out = encoder_forward(src, layer_params, n_heads)
    out = jax.block_until_ready(out)
    assert out.shape == (batch, seq, d_model)
    assert bool(jnp.all(jnp.isfinite(out)))
    print("KERNEL_OK")
</pallas_src>

<mosaic_0001>
module attributes {stable_mosaic.version = 11 : i64} {
  func.func @encoder_stack_kernel(%arg0: i32, %arg1: memref<16x32xf32, #tpu.memory_space<vmem>>, %arg2: memref<16x32xf32, #tpu.memory_space<vmem>>, %arg3: memref<1x32x32xbf16, #tpu.memory_space<vmem>>, %arg4: memref<1x1x32xf32, #tpu.memory_space<vmem>>, %arg5: memref<1x32x32xbf16, #tpu.memory_space<vmem>>, %arg6: memref<1x1x32xf32, #tpu.memory_space<vmem>>, %arg7: memref<1x32x32xbf16, #tpu.memory_space<vmem>>, %arg8: memref<1x1x32xf32, #tpu.memory_space<vmem>>, %arg9: memref<1x32x32xbf16, #tpu.memory_space<vmem>>, %arg10: memref<1x1x32xf32, #tpu.memory_space<vmem>>, %arg11: memref<1x1x32xf32, #tpu.memory_space<vmem>>, %arg12: memref<1x1x32xf32, #tpu.memory_space<vmem>>, %arg13: memref<1x32x64xbf16, #tpu.memory_space<vmem>>, %arg14: memref<1x1x64xf32, #tpu.memory_space<vmem>>, %arg15: memref<1x64x32xbf16, #tpu.memory_space<vmem>>, %arg16: memref<1x1x32xf32, #tpu.memory_space<vmem>>, %arg17: memref<1x1x32xf32, #tpu.memory_space<vmem>>, %arg18: memref<1x1x32xf32, #tpu.memory_space<vmem>>, %arg19: memref<16x32xf32, #tpu.memory_space<vmem>>) attributes {dimension_semantics = [#tpu.dimension_semantics<arbitrary>], iteration_bounds = array<i64: 2>, scalar_prefetch = 0 : i64, scratch_operands = 0 : i64, tpu.core_type = #tpu.core_type<tc>, window_params = [{pipeline_mode = #tpu.pipeline_mode<synchronous>, transform_indices = @transform_0, window_bounds = array<i64: 16, 32>}, {pipeline_mode = #tpu.pipeline_mode<synchronous>, transform_indices = @transform_1, window_bounds = array<i64: 16, 32>}, {transform_indices = @transform_2, window_bounds = array<i64: 1, 32, 32>}, {transform_indices = @transform_3, window_bounds = array<i64: 1, 1, 32>}, {transform_indices = @transform_4, window_bounds = array<i64: 1, 32, 32>}, {transform_indices = @transform_5, window_bounds = array<i64: 1, 1, 32>}, {transform_indices = @transform_6, window_bounds = array<i64: 1, 32, 32>}, {transform_indices = @transform_7, window_bounds = array<i64: 1, 1, 32>}, {transform_indices = @transform_8, window_bounds = array<i64: 1, 32, 32>}, {transform_indices = @transform_9, window_bounds = array<i64: 1, 1, 32>}, {transform_indices = @transform_10, window_bounds = array<i64: 1, 1, 32>}, {transform_indices = @transform_11, window_bounds = array<i64: 1, 1, 32>}, {transform_indices = @transform_12, window_bounds = array<i64: 1, 32, 64>}, {transform_indices = @transform_13, window_bounds = array<i64: 1, 1, 64>}, {transform_indices = @transform_14, window_bounds = array<i64: 1, 64, 32>}, {transform_indices = @transform_15, window_bounds = array<i64: 1, 1, 32>}, {transform_indices = @transform_16, window_bounds = array<i64: 1, 1, 32>}, {transform_indices = @transform_17, window_bounds = array<i64: 1, 1, 32>}, {pipeline_mode = #tpu.pipeline_mode<synchronous>, transform_indices = @transform_18, window_bounds = array<i64: 16, 32>}]} {
    %c0_i32 = arith.constant 0 : i32
    %0 = arith.cmpi eq, %arg0, %c0_i32 : i32
    %1 = arith.extui %0 : i1 to i32
    %c0_i32_0 = arith.constant 0 : i32
    %2 = arith.cmpi ne, %1, %c0_i32_0 : i32
    scf.if %2 {
      %c0_88 = arith.constant 0 : index
      %c0_89 = arith.constant 0 : index
      %196 = vector.load %arg1[%c0_88, %c0_89] : memref<16x32xf32, #tpu.memory_space<vmem>>, vector<16x32xf32>
      %c0_90 = arith.constant 0 : index
      %c0_91 = arith.constant 0 : index
      %197 = vector.load %arg2[%c0_90, %c0_91] : memref<16x32xf32, #tpu.memory_space<vmem>>, vector<16x32xf32>
      %198 = arith.addf %196, %197 : vector<16x32xf32>
      %c0_92 = arith.constant 0 : index
      %c0_93 = arith.constant 0 : index
      %199 = vector.load %arg19[%c0_92, %c0_93] : memref<16x32xf32, #tpu.memory_space<vmem>>, vector<16x32xf32>
      tpu.vector_store %arg19[%c0_92, %c0_93], %198 {strides = array<i32>} : memref<16x32xf32, #tpu.memory_space<vmem>>, vector<16x32xf32>,
    } else {
    }
    %c0 = arith.constant 0 : index
    %c0_1 = arith.constant 0 : index
    %3 = vector.load %arg19[%c0, %c0_1] : memref<16x32xf32, #tpu.memory_space<vmem>>, vector<16x32xf32>
    %4 = arith.truncf %3 : vector<16x32xf32> to vector<16x32xbf16>
    %c0_2 = arith.constant 0 : index
    %c0_3 = arith.constant 0 : index
    %c0_4 = arith.constant 0 : index
    %5 = vector.load %arg3[%c0_2, %c0_3, %c0_4] : memref<1x32x32xbf16, #tpu.memory_space<vmem>>, vector<1x32x32xbf16>
    %6 = vector.shape_cast %5 : vector<1x32x32xbf16> to vector<32x32xbf16>
    %cst = arith.constant dense<0.000000e+00> : vector<16x32xf32>
    %7 = tpu.matmul %4, %6, %cst {dimension_numbers = #tpu.dot_dimension_numbers<[1], [0], [0], [1], [0, 0, 1, 1], [], []>} : vector<16x32xbf16>, vector<32x32xbf16>, vector<16x32xf32> -> vector<16x32xf32>
    %c0_5 = arith.constant 0 : index
    %c0_6 = arith.constant 0 : index
    %c0_7 = arith.constant 0 : index
    %8 = vector.load %arg4[%c0_5, %c0_6, %c0_7] : memref<1x1x32xf32, #tpu.memory_space<vmem>>, vector<1x1x32xf32>
    %9 = vector.shape_cast %8 : vector<1x1x32xf32> to vector<1x32xf32>
    %10 = vector.broadcast %9 : vector<1x32xf32> to vector<16x32xf32>
    %11 = arith.addf %7, %10 : vector<16x32xf32>
    %c0_8 = arith.constant 0 : index
    %c0_9 = arith.constant 0 : index
    %c0_10 = arith.constant 0 : index
    %12 = vector.load %arg5[%c0_8, %c0_9, %c0_10] : memref<1x32x32xbf16, #tpu.memory_space<vmem>>, vector<1x32x32xbf16>
    %13 = vector.shape_cast %12 : vector<1x32x32xbf16> to vector<32x32xbf16>
    %cst_11 = arith.constant dense<0.000000e+00> : vector<16x32xf32>
    %14 = tpu.matmul %4, %13, %cst_11 {dimension_numbers = #tpu.dot_dimension_numbers<[1], [0], [0], [1], [0, 0, 1, 1], [], []>} : vector<16x32xbf16>, vector<32x32xbf16>, vector<16x32xf32> -> vector<16x32xf32>
    %c0_12 = arith.constant 0 : index
    %c0_13 = arith.constant 0 : index
    %c0_14 = arith.constant 0 : index
    %15 = vector.load %arg6[%c0_12, %c0_13, %c0_14] : memref<1x1x32xf32, #tpu.memory_space<vmem>>, vector<1x1x32xf32>
    %16 = vector.shape_cast %15 : vector<1x1x32xf32> to vector<1x32xf32>
    %17 = vector.broadcast %16 : vector<1x32xf32> to vector<16x32xf32>
    %18 = arith.addf %14, %17 : vector<16x32xf32>
    %c0_15 = arith.constant 0 : index
    %c0_16 = arith.constant 0 : index
    %c0_17 = arith.constant 0 : index
    %19 = vector.load %arg7[%c0_15, %c0_16, %c0_17] : memref<1x32x32xbf16, #tpu.memory_space<vmem>>, vector<1x32x32xbf16>
    %20 = vector.shape_cast %19 : vector<1x32x32xbf16> to vector<32x32xbf16>
    %cst_18 = arith.constant dense<0.000000e+00> : vector<16x32xf32>
    %21 = tpu.matmul %4, %20, %cst_18 {dimension_numbers = #tpu.dot_dimension_numbers<[1], [0], [0], [1], [0, 0, 1, 1], [], []>} : vector<16x32xbf16>, vector<32x32xbf16>, vector<16x32xf32> -> vector<16x32xf32>
    %c0_19 = arith.constant 0 : index
    %c0_20 = arith.constant 0 : index
    %c0_21 = arith.constant 0 : index
    %22 = vector.load %arg8[%c0_19, %c0_20, %c0_21] : memref<1x1x32xf32, #tpu.memory_space<vmem>>, vector<1x1x32xf32>
    %23 = vector.shape_cast %22 : vector<1x1x32xf32> to vector<1x32xf32>
    %24 = vector.broadcast %23 : vector<1x32xf32> to vector<16x32xf32>
    %25 = arith.addf %21, %24 : vector<16x32xf32>
    %26 = vector.shape_cast %11 : vector<16x32xf32> to vector<2x8x32xf32>
    %27 = arith.truncf %26 : vector<2x8x32xf32> to vector<2x8x32xbf16>
    %28 = vector.shape_cast %18 : vector<16x32xf32> to vector<2x8x32xf32>
    %29 = arith.truncf %28 : vector<2x8x32xf32> to vector<2x8x32xbf16>
    %30 = vector.shape_cast %25 : vector<16x32xf32> to vector<2x8x32xf32>
    %31 = arith.truncf %30 : vector<2x8x32xf32> to vector<2x8x32xbf16>
    %c0_22 = arith.constant 0 : index
    %c0_23 = arith.constant 0 : index
    %c0_24 = arith.constant 0 : index
    %32 = vector.load %arg9[%c0_22, %c0_23, %c0_24] : memref<1x32x32xbf16, #tpu.memory_space<vmem>>, vector<1x32x32xbf16>
    %33 = vector.shape_cast %32 : vector<1x32x32xbf16> to vector<32x32xbf16>
    %cst_25 = arith.constant 0.000000e+00 : f32
    %34 = vector.broadcast %cst_25 : f32 to vector<16x32xf32>
    %35 = vector.extract_strided_slice %27 {offsets = [0, 0, 0], sizes = [2, 8, 8], strides = [1, 1, 1]} : vector<2x8x32xbf16> to vector<2x8x8xbf16>
    %36 = vector.extract_strided_slice %29 {offsets = [0, 0, 0], sizes = [2, 8, 8], strides = [1, 1, 1]} : vector<2x8x32xbf16> to vector<2x8x8xbf16>
    %37 = vector.extract_strided_slice %31 {offsets = [0, 0, 0], sizes = [2, 8, 8], strides = [1, 1, 1]} : vector<2x8x32xbf16> to vector<2x8x8xbf16>
    "tpu.trace_start"() <{level = 10 : i32, message = "bqd,bkd->bqk"}> : () -> ()
    %cst_26 = arith.constant dense<0.000000e+00> : vector<2x8x8xf32>
    %38 = tpu.matmul %35, %36, %cst_26 {dimension_numbers = #tpu.dot_dimension_numbers<[2], [2], [1], [1], [0, 0, 0, 1, 1, 1], [0], [0]>} : vector<2x8x8xbf16>, vector<2x8x8xbf16>, vector<2x8x8xf32> -> vector<2x8x8xf32>
    "tpu.trace_stop"() : () -> ()
    %cst_27 = arith.constant dense<0xFF800000> : vector<2x8xf32>
    %39 = vector.multi_reduction <maximumf>, %38, %cst_27 [2] : vector<2x8x8xf32> to vector<2x8xf32>
    %40 = vector.shape_cast %39 : vector<2x8xf32> to vector<2x8x1xf32>
    %41 = vector.broadcast %40 : vector<2x8x1xf32> to vector<2x8x8xf32>
    %42 = arith.subf %38, %41 : vector<2x8x8xf32>
    %43 = math.exp %42 : vector<2x8x8xf32>
    %cst_28 = arith.constant dense<0.000000e+00> : vector<2x8xf32>
    %44 = vector.multi_reduction <add>, %43, %cst_28 [2] : vector<2x8x8xf32> to vector<2x8xf32>
    %45 = vector.shape_cast %44 : vector<2x8xf32> to vector<2x8x1xf32>
    %46 = tpu.reciprocal %45 {approx = true} : vector<2x8x1xf32> -> vector<2x8x1xf32>
    %47 = vector.broadcast %46 : vector<2x8x1xf32> to vector<2x8x8xf32>
    %48 = arith.mulf %43, %47 : vector<2x8x8xf32>
    %49 = arith.truncf %48 : vector<2x8x8xf32> to vector<2x8x8xbf16>
    "tpu.trace_start"() <{level = 10 : i32, message = "bqk,bkd->bqd"}> : () -> ()
    %cst_29 = arith.constant dense<0.000000e+00> : vector<2x8x8xf32>
    %50 = tpu.matmul %49, %37, %cst_29 {dimension_numbers = #tpu.dot_dimension_numbers<[2], [1], [1], [2], [0, 0, 0, 1, 1, 2], [0], [0]>} : vector<2x8x8xbf16>, vector<2x8x8xbf16>, vector<2x8x8xf32> -> vector<2x8x8xf32>
    "tpu.trace_stop"() : () -> ()
    %51 = vector.shape_cast %50 : vector<2x8x8xf32> to vector<16x8xf32>
    %52 = arith.truncf %51 : vector<16x8xf32> to vector<16x8xbf16>
    %53 = vector.extract_strided_slice %33 {offsets = [0, 0], sizes = [8, 32], strides = [1, 1]} : vector<32x32xbf16> to vector<8x32xbf16>
    %cst_30 = arith.constant dense<0.000000e+00> : vector<16x32xf32>
    %54 = tpu.matmul %52, %53, %cst_30 {dimension_numbers = #tpu.dot_dimension_numbers<[1], [0], [0], [1], [0, 0, 1, 1], [], []>} : vector<16x8xbf16>, vector<8x32xbf16>, vector<16x32xf32> -> vector<16x32xf32>
    %55 = arith.addf %34, %54 : vector<16x32xf32>
    %56 = vector.extract_strided_slice %27 {offsets = [0, 0, 8], sizes = [2, 8, 8], strides = [1, 1, 1]} : vector<2x8x32xbf16> to vector<2x8x8xbf16>
    %57 = vector.extract_strided_slice %29 {offsets = [0, 0, 8], sizes = [2, 8, 8], strides = [1, 1, 1]} : vector<2x8x32xbf16> to vector<2x8x8xbf16>
    %58 = vector.extract_strided_slice %31 {offsets = [0, 0, 8], sizes = [2, 8, 8], strides = [1, 1, 1]} : vector<2x8x32xbf16> to vector<2x8x8xbf16>
    "tpu.trace_start"() <{level = 10 : i32, message = "bqd,bkd->bqk"}> : () -> ()
    %cst_31 = arith.constant dense<0.000000e+00> : vector<2x8x8xf32>
    %59 = tpu.matmul %56, %57, %cst_31 {dimension_numbers = #tpu.dot_dimension_numbers<[2], [2], [1], [1], [0, 0, 0, 1, 1, 1], [0], [0]>} : vector<2x8x8xbf16>, vector<2x8x8xbf16>, vector<2x8x8xf32> -> vector<2x8x8xf32>
    "tpu.trace_stop"() : () -> ()
    %cst_32 = arith.constant dense<0xFF800000> : vector<2x8xf32>
    %60 = vector.multi_reduction <maximumf>, %59, %cst_32 [2] : vector<2x8x8xf32> to vector<2x8xf32>
    %61 = vector.shape_cast %60 : vector<2x8xf32> to vector<2x8x1xf32>
    %62 = vector.broadcast %61 : vector<2x8x1xf32> to vector<2x8x8xf32>
    %63 = arith.subf %59, %62 : vector<2x8x8xf32>
    %64 = math.exp %63 : vector<2x8x8xf32>
    %cst_33 = arith.constant dense<0.000000e+00> : vector<2x8xf32>
    %65 = vector.multi_reduction <add>, %64, %cst_33 [2] : vector<2x8x8xf32> to vector<2x8xf32>
    %66 = vector.shape_cast %65 : vector<2x8xf32> to vector<2x8x1xf32>
    %67 = tpu.reciprocal %66 {approx = true} : vector<2x8x1xf32> -> vector<2x8x1xf32>
    %68 = vector.broadcast %67 : vector<2x8x1xf32> to vector<2x8x8xf32>
    %69 = arith.mulf %64, %68 : vector<2x8x8xf32>
    %70 = arith.truncf %69 : vector<2x8x8xf32> to vector<2x8x8xbf16>
    "tpu.trace_start"() <{level = 10 : i32, message = "bqk,bkd->bqd"}> : () -> ()
    %cst_34 = arith.constant dense<0.000000e+00> : vector<2x8x8xf32>
    %71 = tpu.matmul %70, %58, %cst_34 {dimension_numbers = #tpu.dot_dimension_numbers<[2], [1], [1], [2], [0, 0, 0, 1, 1, 2], [0], [0]>} : vector<2x8x8xbf16>, vector<2x8x8xbf16>, vector<2x8x8xf32> -> vector<2x8x8xf32>
    "tpu.trace_stop"() : () -> ()
    %72 = vector.shape_cast %71 : vector<2x8x8xf32> to vector<16x8xf32>
    %73 = arith.truncf %72 : vector<16x8xf32> to vector<16x8xbf16>
    %74 = vector.extract_strided_slice %33 {offsets = [8, 0], sizes = [8, 32], strides = [1, 1]} : vector<32x32xbf16> to vector<8x32xbf16>
    %cst_35 = arith.constant dense<0.000000e+00> : vector<16x32xf32>
    %75 = tpu.matmul %73, %74, %cst_35 {dimension_numbers = #tpu.dot_dimension_numbers<[1], [0], [0], [1], [0, 0, 1, 1], [], []>} : vector<16x8xbf16>, vector<8x32xbf16>, vector<16x32xf32> -> vector<16x32xf32>
    %76 = arith.addf %55, %75 : vector<16x32xf32>
    %77 = vector.extract_strided_slice %27 {offsets = [0, 0, 16], sizes = [2, 8, 8], strides = [1, 1, 1]} : vector<2x8x32xbf16> to vector<2x8x8xbf16>
    %78 = vector.extract_strided_slice %29 {offsets = [0, 0, 16], sizes = [2, 8, 8], strides = [1, 1, 1]} : vector<2x8x32xbf16> to vector<2x8x8xbf16>
    %79 = vector.extract_strided_slice %31 {offsets = [0, 0, 16], sizes = [2, 8, 8], strides = [1, 1, 1]} : vector<2x8x32xbf16> to vector<2x8x8xbf16>
    "tpu.trace_start"() <{level = 10 : i32, message = "bqd,bkd->bqk"}> : () -> ()
    %cst_36 = arith.constant dense<0.000000e+00> : vector<2x8x8xf32>
    %80 = tpu.matmul %77, %78, %cst_36 {dimension_numbers = #tpu.dot_dimension_numbers<[2], [2], [1], [1], [0, 0, 0, 1, 1, 1], [0], [0]>} : vector<2x8x8xbf16>, vector<2x8x8xbf16>, vector<2x8x8xf32> -> vector<2x8x8xf32>
    "tpu.trace_stop"() : () -> ()
    %cst_37 = arith.constant dense<0xFF800000> : vector<2x8xf32>
    %81 = vector.multi_reduction <maximumf>, %80, %cst_37 [2] : vector<2x8x8xf32> to vector<2x8xf32>
    %82 = vector.shape_cast %81 : vector<2x8xf32> to vector<2x8x1xf32>
    %83 = vector.broadcast %82 : vector<2x8x1xf32> to vector<2x8x8xf32>
    %84 = arith.subf %80, %83 : vector<2x8x8xf32>
    %85 = math.exp %84 : vector<2x8x8xf32>
    %cst_38 = arith.constant dense<0.000000e+00> : vector<2x8xf32>
    %86 = vector.multi_reduction <add>, %85, %cst_38 [2] : vector<2x8x8xf32> to vector<2x8xf32>
    %87 = vector.shape_cast %86 : vector<2x8xf32> to vector<2x8x1xf32>
    %88 = tpu.reciprocal %87 {approx = true} : vector<2x8x1xf32> -> vector<2x8x1xf32>
    %89 = vector.broadcast %88 : vector<2x8x1xf32> to vector<2x8x8xf32>
    %90 = arith.mulf %85, %89 : vector<2x8x8xf32>
    %91 = arith.truncf %90 : vector<2x8x8xf32> to vector<2x8x8xbf16>
    "tpu.trace_start"() <{level = 10 : i32, message = "bqk,bkd->bqd"}> : () -> ()
    %cst_39 = arith.constant dense<0.000000e+00> : vector<2x8x8xf32>
    %92 = tpu.matmul %91, %79, %cst_39 {dimension_numbers = #tpu.dot_dimension_numbers<[2], [1], [1], [2], [0, 0, 0, 1, 1, 2], [0], [0]>} : vector<2x8x8xbf16>, vector<2x8x8xbf16>, vector<2x8x8xf32> -> vector<2x8x8xf32>
    "tpu.trace_stop"() : () -> ()
    %93 = vector.shape_cast %92 : vector<2x8x8xf32> to vector<16x8xf32>
    %94 = arith.truncf %93 : vector<16x8xf32> to vector<16x8xbf16>
    %95 = vector.extract_strided_slice %33 {offsets = [16, 0], sizes = [8, 32], strides = [1, 1]} : vector<32x32xbf16> to vector<8x32xbf16>
    %cst_40 = arith.constant dense<0.000000e+00> : vector<16x32xf32>
    %96 = tpu.matmul %94, %95, %cst_40 {dimension_numbers = #tpu.dot_dimension_numbers<[1], [0], [0], [1], [0, 0, 1, 1], [], []>} : vector<16x8xbf16>, vector<8x32xbf16>, vector<16x32xf32> -> vector<16x32xf32>
    %97 = arith.addf %76, %96 : vector<16x32xf32>
    %98 = vector.extract_strided_slice %27 {offsets = [0, 0, 24], sizes = [2, 8, 8], strides = [1, 1, 1]} : vector<2x8x32xbf16> to vector<2x8x8xbf16>
    %99 = vector.extract_strided_slice %29 {offsets = [0, 0, 24], sizes = [2, 8, 8], strides = [1, 1, 1]} : vector<2x8x32xbf16> to vector<2x8x8xbf16>
    %100 = vector.extract_strided_slice %31 {offsets = [0, 0, 24], sizes = [2, 8, 8], strides = [1, 1, 1]} : vector<2x8x32xbf16> to vector<2x8x8xbf16>
    "tpu.trace_start"() <{level = 10 : i32, message = "bqd,bkd->bqk"}> : () -> ()
    %cst_41 = arith.constant dense<0.000000e+00> : vector<2x8x8xf32>
    %101 = tpu.matmul %98, %99, %cst_41 {dimension_numbers = #tpu.dot_dimension_numbers<[2], [2], [1], [1], [0, 0, 0, 1, 1, 1], [0], [0]>} : vector<2x8x8xbf16>, vector<2x8x8xbf16>, vector<2x8x8xf32> -> vector<2x8x8xf32>
    "tpu.trace_stop"() : () -> ()
    %cst_42 = arith.constant dense<0xFF800000> : vector<2x8xf32>
    %102 = vector.multi_reduction <maximumf>, %101, %cst_42 [2] : vector<2x8x8xf32> to vector<2x8xf32>
    %103 = vector.shape_cast %102 : vector<2x8xf32> to vector<2x8x1xf32>
    %104 = vector.broadcast %103 : vector<2x8x1xf32> to vector<2x8x8xf32>
    %105 = arith.subf %101, %104 : vector<2x8x8xf32>
    %106 = math.exp %105 : vector<2x8x8xf32>
    %cst_43 = arith.constant dense<0.000000e+00> : vector<2x8xf32>
    %107 = vector.multi_reduction <add>, %106, %cst_43 [2] : vector<2x8x8xf32> to vector<2x8xf32>
    %108 = vector.shape_cast %107 : vector<2x8xf32> to vector<2x8x1xf32>
    %109 = tpu.reciprocal %108 {approx = true} : vector<2x8x1xf32> -> vector<2x8x1xf32>
    %110 = vector.broadcast %109 : vector<2x8x1xf32> to vector<2x8x8xf32>
    %111 = arith.mulf %106, %110 : vector<2x8x8xf32>
    %112 = arith.truncf %111 : vector<2x8x8xf32> to vector<2x8x8xbf16>
    "tpu.trace_start"() <{level = 10 : i32, message = "bqk,bkd->bqd"}> : () -> ()
    %cst_44 = arith.constant dense<0.000000e+00> : vector<2x8x8xf32>
    %113 = tpu.matmul %112, %100, %cst_44 {dimension_numbers = #tpu.dot_dimension_numbers<[2], [1], [1], [2], [0, 0, 0, 1, 1, 2], [0], [0]>} : vector<2x8x8xbf16>, vector<2x8x8xbf16>, vector<2x8x8xf32> -> vector<2x8x8xf32>
    "tpu.trace_stop"() : () -> ()
    %114 = vector.shape_cast %113 : vector<2x8x8xf32> to vector<16x8xf32>
    %115 = arith.truncf %114 : vector<16x8xf32> to vector<16x8xbf16>
    %116 = vector.extract_strided_slice %33 {offsets = [24, 0], sizes = [8, 32], strides = [1, 1]} : vector<32x32xbf16> to vector<8x32xbf16>
    %cst_45 = arith.constant dense<0.000000e+00> : vector<16x32xf32>
    %117 = tpu.matmul %115, %116, %cst_45 {dimension_numbers = #tpu.dot_dimension_numbers<[1], [0], [0], [1], [0, 0, 1, 1], [], []>} : vector<16x8xbf16>, vector<8x32xbf16>, vector<16x32xf32> -> vector<16x32xf32>
    %118 = arith.addf %97, %117 : vector<16x32xf32>
    %c0_46 = arith.constant 0 : index
    %c0_47 = arith.constant 0 : index
    %c0_48 = arith.constant 0 : index
    %119 = vector.load %arg10[%c0_46, %c0_47, %c0_48] : memref<1x1x32xf32, #tpu.memory_space<vmem>>, vector<1x1x32xf32>
    %120 = vector.shape_cast %119 : vector<1x1x32xf32> to vector<1x32xf32>
    %121 = vector.broadcast %120 : vector<1x32xf32> to vector<16x32xf32>
    %122 = arith.addf %118, %121 : vector<16x32xf32>
    %123 = arith.addf %3, %122 : vector<16x32xf32>
    %c0_49 = arith.constant 0 : index
    %c0_50 = arith.constant 0 : index
    %c0_51 = arith.constant 0 : index
    %124 = vector.load %arg11[%c0_49, %c0_50, %c0_51] : memref<1x1x32xf32, #tpu.memory_space<vmem>>, vector<1x1x32xf32>
    %125 = vector.shape_cast %124 : vector<1x1x32xf32> to vector<1x32xf32>
    %c0_52 = arith.constant 0 : index
    %c0_53 = arith.constant 0 : index
    %c0_54 = arith.constant 0 : index
    %126 = vector.load %arg12[%c0_52, %c0_53, %c0_54] : memref<1x1x32xf32, #tpu.memory_space<vmem>>, vector<1x1x32xf32>
    %127 = vector.shape_cast %126 : vector<1x1x32xf32> to vector<1x32xf32>
    %cst_55 = arith.constant dense<0.000000e+00> : vector<16xf32>
    %128 = vector.multi_reduction <add>, %123, %cst_55 [1] : vector<16x32xf32> to vector<16xf32>
    %129 = vector.shape_cast %128 : vector<16xf32> to vector<16x1xf32>
    %cst_56 = arith.constant 3.200000e+01 : f32
    %130 = vector.broadcast %cst_56 : f32 to vector<16x1xf32>
    %131 = arith.divf %129, %130 : vector<16x1xf32>
    %132 = vector.broadcast %131 : vector<16x1xf32> to vector<16x32xf32>
    %133 = arith.subf %123, %132 : vector<16x32xf32>
    %134 = arith.mulf %133, %133 : vector<16x32xf32>
    %cst_57 = arith.constant dense<0.000000e+00> : vector<16xf32>
    %135 = vector.multi_reduction <add>, %134, %cst_57 [1] : vector<16x32xf32> to vector<16xf32>
    %136 = vector.shape_cast %135 : vector<16xf32> to vector<16x1xf32>
    %cst_58 = arith.constant 3.200000e+01 : f32
    %137 = vector.broadcast %cst_58 : f32 to vector<16x1xf32>
    %138 = arith.divf %136, %137 : vector<16x1xf32>
    %139 = vector.broadcast %131 : vector<16x1xf32> to vector<16x32xf32>
    %140 = arith.subf %123, %139 : vector<16x32xf32>
    %cst_59 = arith.constant 9.99999974E-6 : f32
    %141 = vector.broadcast %cst_59 : f32 to vector<16x1xf32>
    %142 = arith.addf %138, %141 : vector<16x1xf32>
    %143 = math.rsqrt %142 : vector<16x1xf32>
    %144 = vector.broadcast %143 : vector<16x1xf32> to vector<16x32xf32>
    %145 = arith.mulf %140, %144 : vector<16x32xf32>
    %146 = vector.broadcast %125 : vector<1x32xf32> to vector<16x32xf32>
    %147 = arith.mulf %145, %146 : vector<16x32xf32>
    %148 = vector.broadcast %127 : vector<1x32xf32> to vector<16x32xf32>
    %149 = arith.addf %147, %148 : vector<16x32xf32>
    %150 = arith.truncf %149 : vector<16x32xf32> to vector<16x32xbf16>
    %c0_60 = arith.constant 0 : index
    %c0_61 = arith.constant 0 : index
    %c0_62 = arith.constant 0 : index
    %151 = vector.load %arg13[%c0_60, %c0_61, %c0_62] : memref<1x32x64xbf16, #tpu.memory_space<vmem>>, vector<1x32x64xbf16>
    %152 = vector.shape_cast %151 : vector<1x32x64xbf16> to vector<32x64xbf16>
    %cst_63 = arith.constant dense<0.000000e+00> : vector<16x64xf32>
    %153 = tpu.matmul %150, %152, %cst_63 {dimension_numbers = #tpu.dot_dimension_numbers<[1], [0], [0], [1], [0, 0, 1, 1], [], []>} : vector<16x32xbf16>, vector<32x64xbf16>, vector<16x64xf32> -> vector<16x64xf32>
    %c0_64 = arith.constant 0 : index
    %c0_65 = arith.constant 0 : index
    %c0_66 = arith.constant 0 : index
    %154 = vector.load %arg14[%c0_64, %c0_65, %c0_66] : memref<1x1x64xf32, #tpu.memory_space<vmem>>, vector<1x1x64xf32>
    %155 = vector.shape_cast %154 : vector<1x1x64xf32> to vector<1x64xf32>
    %156 = vector.broadcast %155 : vector<1x64xf32> to vector<16x64xf32>
    %157 = arith.addf %153, %156 : vector<16x64xf32>
    %cst_67 = arith.constant 0.000000e+00 : f32
    %158 = vector.broadcast %cst_67 : f32 to vector<16x64xf32>
    %159 = arith.maximumf %157, %158 : vector<16x64xf32>
    %160 = arith.truncf %159 : vector<16x64xf32> to vector<16x64xbf16>
    %c0_68 = arith.constant 0 : index
    %c0_69 = arith.constant 0 : index
    %c0_70 = arith.constant 0 : index
    %161 = vector.load %arg15[%c0_68, %c0_69, %c0_70] : memref<1x64x32xbf16, #tpu.memory_space<vmem>>, vector<1x64x32xbf16>
    %162 = vector.shape_cast %161 : vector<1x64x32xbf16> to vector<64x32xbf16>
    %cst_71 = arith.constant dense<0.000000e+00> : vector<16x32xf32>
    %163 = tpu.matmul %160, %162, %cst_71 {dimension_numbers = #tpu.dot_dimension_numbers<[1], [0], [0], [1], [0, 0, 1, 1], [], []>} : vector<16x64xbf16>, vector<64x32xbf16>, vector<16x32xf32> -> vector<16x32xf32>
    %c0_72 = arith.constant 0 : index
    %c0_73 = arith.constant 0 : index
    %c0_74 = arith.constant 0 : index
    %164 = vector.load %arg16[%c0_72, %c0_73, %c0_74] : memref<1x1x32xf32, #tpu.memory_space<vmem>>, vector<1x1x32xf32>
    %165 = vector.shape_cast %164 : vector<1x1x32xf32> to vector<1x32xf32>
    %166 = vector.broadcast %165 : vector<1x32xf32> to vector<16x32xf32>
    %167 = arith.addf %163, %166 : vector<16x32xf32>
    %168 = arith.addf %149, %167 : vector<16x32xf32>
    %c0_75 = arith.constant 0 : index
    %c0_76 = arith.constant 0 : index
    %c0_77 = arith.constant 0 : index
    %169 = vector.load %arg17[%c0_75, %c0_76, %c0_77] : memref<1x1x32xf32, #tpu.memory_space<vmem>>, vector<1x1x32xf32>
    %170 = vector.shape_cast %169 : vector<1x1x32xf32> to vector<1x32xf32>
    %c0_78 = arith.constant 0 : index
    %c0_79 = arith.constant 0 : index
    %c0_80 = arith.constant 0 : index
    %171 = vector.load %arg18[%c0_78, %c0_79, %c0_80] : memref<1x1x32xf32, #tpu.memory_space<vmem>>, vector<1x1x32xf32>
    %172 = vector.shape_cast %171 : vector<1x1x32xf32> to vector<1x32xf32>
    %cst_81 = arith.constant dense<0.000000e+00> : vector<16xf32>
    %173 = vector.multi_reduction <add>, %168, %cst_81 [1] : vector<16x32xf32> to vector<16xf32>
    %174 = vector.shape_cast %173 : vector<16xf32> to vector<16x1xf32>
    %cst_82 = arith.constant 3.200000e+01 : f32
    %175 = vector.broadcast %cst_82 : f32 to vector<16x1xf32>
    %176 = arith.divf %174, %175 : vector<16x1xf32>
    %177 = vector.broadcast %176 : vector<16x1xf32> to vector<16x32xf32>
    %178 = arith.subf %168, %177 : vector<16x32xf32>
    %179 = arith.mulf %178, %178 : vector<16x32xf32>
    %cst_83 = arith.constant dense<0.000000e+00> : vector<16xf32>
    %180 = vector.multi_reduction <add>, %179, %cst_83 [1] : vector<16x32xf32> to vector<16xf32>
    %181 = vector.shape_cast %180 : vector<16xf32> to vector<16x1xf32>
    %cst_84 = arith.constant 3.200000e+01 : f32
    %182 = vector.broadcast %cst_84 : f32 to vector<16x1xf32>
    %183 = arith.divf %181, %182 : vector<16x1xf32>
    %184 = vector.broadcast %176 : vector<16x1xf32> to vector<16x32xf32>
    %185 = arith.subf %168, %184 : vector<16x32xf32>
    %cst_85 = arith.constant 9.99999974E-6 : f32
    %186 = vector.broadcast %cst_85 : f32 to vector<16x1xf32>
    %187 = arith.addf %183, %186 : vector<16x1xf32>
    %188 = math.rsqrt %187 : vector<16x1xf32>
    %189 = vector.broadcast %188 : vector<16x1xf32> to vector<16x32xf32>
    %190 = arith.mulf %185, %189 : vector<16x32xf32>
    %191 = vector.broadcast %170 : vector<1x32xf32> to vector<16x32xf32>
    %192 = arith.mulf %190, %191 : vector<16x32xf32>
    %193 = vector.broadcast %172 : vector<1x32xf32> to vector<16x32xf32>
    %194 = arith.addf %192, %193 : vector<16x32xf32>
    %c0_86 = arith.constant 0 : index
    %c0_87 = arith.constant 0 : index
    %195 = vector.load %arg19[%c0_86, %c0_87] : memref<16x32xf32, #tpu.memory_space<vmem>>, vector<16x32xf32>
    tpu.vector_store %arg19[%c0_86, %c0_87], %194 {strides = array<i32>} : memref<16x32xf32, #tpu.memory_space<vmem>>, vector<16x32xf32>,
    return
  }
  func.func @transform_0(%arg0: i32) -> (i32, i32) {
    %c0_i32 = arith.constant 0 : i32
    %c0_i32_0 = arith.constant 0 : i32
    %c0_i32_1 = arith.constant 0 : i32
    return %c0_i32, %c0_i32_0 : i32, i32
  }
  func.func @transform_1(%arg0: i32) -> (i32, i32) {
    %c0_i32 = arith.constant 0 : i32
    %c0_i32_0 = arith.constant 0 : i32
    %c0_i32_1 = arith.constant 0 : i32
    return %c0_i32, %c0_i32_0 : i32, i32
  }
  func.func @transform_2(%arg0: i32) -> (i32, i32, i32) {
    %c0_i32 = arith.constant 0 : i32
    %c0_i32_0 = arith.constant 0 : i32
    %c0_i32_1 = arith.constant 0 : i32
    return %arg0, %c0_i32, %c0_i32_0 : i32, i32, i32
  }
  func.func @transform_3(%arg0: i32) -> (i32, i32, i32) {
    %c0_i32 = arith.constant 0 : i32
    %c0_i32_0 = arith.constant 0 : i32
    %c0_i32_1 = arith.constant 0 : i32
    return %arg0, %c0_i32, %c0_i32_0 : i32, i32, i32
  }
  func.func @transform_4(%arg0: i32) -> (i32, i32, i32) {
    %c0_i32 = arith.constant 0 : i32
    %c0_i32_0 = arith.constant 0 : i32
    %c0_i32_1 = arith.constant 0 : i32
    return %arg0, %c0_i32, %c0_i32_0 : i32, i32, i32
  }
  func.func @transform_5(%arg0: i32) -> (i32, i32, i32) {
    %c0_i32 = arith.constant 0 : i32
    %c0_i32_0 = arith.constant 0 : i32
    %c0_i32_1 = arith.constant 0 : i32
    return %arg0, %c0_i32, %c0_i32_0 : i32, i32, i32
  }
  func.func @transform_6(%arg0: i32) -> (i32, i32, i32) {
    %c0_i32 = arith.constant 0 : i32
    %c0_i32_0 = arith.constant 0 : i32
    %c0_i32_1 = arith.constant 0 : i32
    return %arg0, %c0_i32, %c0_i32_0 : i32, i32, i32
  }
  func.func @transform_7(%arg0: i32) -> (i32, i32, i32) {
    %c0_i32 = arith.constant 0 : i32
    %c0_i32_0 = arith.constant 0 : i32
    %c0_i32_1 = arith.constant 0 : i32
    return %arg0, %c0_i32, %c0_i32_0 : i32, i32, i32
  }
  func.func @transform_8(%arg0: i32) -> (i32, i32, i32) {
    %c0_i32 = arith.constant 0 : i32
    %c0_i32_0 = arith.constant 0 : i32
    %c0_i32_1 = arith.constant 0 : i32
    return %arg0, %c0_i32, %c0_i32_0 : i32, i32, i32
  }
  func.func @transform_9(%arg0: i32) -> (i32, i32, i32) {
    %c0_i32 = arith.constant 0 : i32
    %c0_i32_0 = arith.constant 0 : i32
    %c0_i32_1 = arith.constant 0 : i32
    return %arg0, %c0_i32, %c0_i32_0 : i32, i32, i32
  }
  func.func @transform_10(%arg0: i32) -> (i32, i32, i32) {
    %c0_i32 = arith.constant 0 : i32
    %c0_i32_0 = arith.constant 0 : i32
    %c0_i32_1 = arith.constant 0 : i32
    return %arg0, %c0_i32, %c0_i32_0 : i32, i32, i32
  }
  func.func @transform_11(%arg0: i32) -> (i32, i32, i32) {
    %c0_i32 = arith.constant 0 : i32
    %c0_i32_0 = arith.constant 0 : i32
    %c0_i32_1 = arith.constant 0 : i32
    return %arg0, %c0_i32, %c0_i32_0 : i32, i32, i32
  }
  func.func @transform_12(%arg0: i32) -> (i32, i32, i32) {
    %c0_i32 = arith.constant 0 : i32
    %c0_i32_0 = arith.constant 0 : i32
    %c0_i32_1 = arith.constant 0 : i32
    return %arg0, %c0_i32, %c0_i32_0 : i32, i32, i32
  }
  func.func @transform_13(%arg0: i32) -> (i32, i32, i32) {
    %c0_i32 = arith.constant 0 : i32
    %c0_i32_0 = arith.constant 0 : i32
    %c0_i32_1 = arith.constant 0 : i32
    return %arg0, %c0_i32, %c0_i32_0 : i32, i32, i32
  }
  func.func @transform_14(%arg0: i32) -> (i32, i32, i32) {
    %c0_i32 = arith.constant 0 : i32
    %c0_i32_0 = arith.constant 0 : i32
    %c0_i32_1 = arith.constant 0 : i32
    return %arg0, %c0_i32, %c0_i32_0 : i32, i32, i32
  }
  func.func @transform_15(%arg0: i32) -> (i32, i32, i32) {
    %c0_i32 = arith.constant 0 : i32
    %c0_i32_0 = arith.constant 0 : i32
    %c0_i32_1 = arith.constant 0 : i32
    return %arg0, %c0_i32, %c0_i32_0 : i32, i32, i32
  }
  func.func @transform_16(%arg0: i32) -> (i32, i32, i32) {
    %c0_i32 = arith.constant 0 : i32
    %c0_i32_0 = arith.constant 0 : i32
    %c0_i32_1 = arith.constant 0 : i32
    return %arg0, %c0_i32, %c0_i32_0 : i32, i32, i32
  }
  func.func @transform_17(%arg0: i32) -> (i32, i32, i32) {
    %c0_i32 = arith.constant 0 : i32
    %c0_i32_0 = arith.constant 0 : i32
    %c0_i32_1 = arith.constant 0 : i32
    return %arg0, %c0_i32, %c0_i32_0 : i32, i32, i32
  }
  func.func @transform_18(%arg0: i32) -> (i32, i32) {
    %c0_i32 = arith.constant 0 : i32
    %c0_i32_0 = arith.constant 0 : i32
    %c0_i32_1 = arith.constant 0 : i32
    return %c0_i32, %c0_i32_0 : i32, i32
  }
}

</mosaic_0001>

<bundles_post_ra>
// kernel: tpu_custom_call.1
= control target key start
LH: loop header
LB: loop body
LE: loop exit
PB: predicated region body
PF: predicated region fallthrough
CT: control target
= control target key end

     0   :  { %s3965_s0 = inlined_call_operand.hbm [shape: f32[16,32], index: 0, kind: input, shape index: {}]   ;;  %s3966_s1 = inlined_call_operand.hbm [shape: f32[16,32], index: 1, kind: input, shape index: {}]   ;;  %s3967_s2 = inlined_call_operand.vmem [shape: bf16[2,32,32], index: 2, kind: input, shape index: {}]   ;;  %s3968_s3 = inlined_call_operand.vmem [shape: f32[2,1,32], index: 3, kind: input, shape index: {}]   ;;  %s3969_s4 = inlined_call_operand.vmem [shape: bf16[2,32,32], index: 4, kind: input, shape index: {}]   ;;  %s3970_s5 = inlined_call_operand.vmem [shape: f32[2,1,32], index: 5, kind: input, shape index: {}]   ;;  %s3971_s6 = inlined_call_operand.vmem [shape: bf16[2,32,32], index: 6, kind: input, shape index: {}]   ;;  %s3972_s7 = inlined_call_operand.vmem [shape: f32[2,1,32], index: 7, kind: input, shape index: {}]   ;;  %s3973_s8 = inlined_call_operand.hbm [shape: bf16[2,32,32], index: 8, kind: input, shape index: {}]   ;;  %s3974_s9 = inlined_call_operand.vmem [shape: f32[2,1,32], index: 9, kind: input, shape index: {}]   ;;  %s3975_s10 = inlined_call_operand.vmem [shape: f32[2,1,32], index: 10, kind: input, shape index: {}]   ;;  %s3976_s11 = inlined_call_operand.vmem [shape: f32[2,1,32], index: 11, kind: input, shape index: {}]   ;;  %s3977_s12 = inlined_call_operand.hbm [shape: bf16[2,32,64], index: 12, kind: input, shape index: {}]   ;;  %s3978_s13 = inlined_call_operand.vmem [shape: f32[2,1,64], index: 13, kind: input, shape index: {}]   ;;  %s3979_s14 = inlined_call_operand.vmem [shape: bf16[2,64,32], index: 14, kind: input, shape index: {}]   ;;  %s3980_s15 = inlined_call_operand.vmem [shape: f32[2,1,32], index: 15, kind: input, shape index: {}]   ;;  %s3981_s16 = inlined_call_operand.vmem [shape: f32[2,1,32], index: 16, kind: input, shape index: {}]   ;;  %s3982_s17 = inlined_call_operand.vmem [shape: f32[2,1,32], index: 17, kind: input, shape index: {}]   ;;  %s3983_s18 = inlined_call_operand.hbm [shape: f32[16,32], index: 18, kind: output, shape index: {}]  }
   0x1   :  { %3993 = sst [smem:[#allocation18_spill]] %s3965_s0 }
   0x2   :  { %3994 = sst [smem:[#allocation19_spill]] %s3966_s1 }
   0x3   :  { %3995 = sst [smem:[#allocation20_spill]] %s3967_s2 }
   0x4   :  { %3996 = sst [smem:[#allocation21_spill]] %s3969_s4 }
   0x5   :  { %3997 = sst [smem:[#allocation22_spill]] %s3971_s6 }
   0x6   :  { %3998 = sst [smem:[#allocation23_spill]] %s3973_s8 }
   0x7   :  { %3999 = sst [smem:[#allocation24_spill]] %s3974_s9 }
   0x8   :  { %4000 = sst [smem:[#allocation25_spill]] %s3975_s10 }
   0x9   :  { %4001 = sst [smem:[#allocation26_spill]] %s3976_s11 }
   0xa   :  { %4002 = sst [smem:[#allocation27_spill]] %s3977_s12 }
   0xb   :  { %4003 = sst [smem:[#allocation28_spill]] %s3978_s13 }
   0xc   :  { %4004 = sst [smem:[#allocation29_spill]] %s3979_s14 }
   0xd   :  { %4005 = sst [smem:[#allocation30_spill]] %s3980_s15 }
   0xe   :  { %4006 = sst [smem:[#allocation31_spill]] %s3981_s16 }
   0xf   :  { %4007 = sst [smem:[#allocation32_spill]] %s3982_s17 }
  0x10   :  { %4008 = sst [smem:[#allocation33_spill]] %s3983_s18 }
  0x11   :  { %23 = vsyncpa [#allocation3], 0 }
  0x12   :  { %24 = vsyncpa [#allocation6], 0 }
  0x13   :  { %25 = vsyncpa [#allocation4], 0  ;;  %s3385_s27 = smov 0   ;;  %s3387_s28 = smov 0  }
  0x14   :  { %s3389_s29 = smov 0   ;;  %s3391_s30 = smov 0  }
  0x15 LB: > { %4009 = sst [smem:[#allocation14_spill]] %s3264_s28  ;;  %s3404_s0 = sadd.s32 4294967295, %s3272_s30   ;;  %s3272_s30 = sphi %s3391_s30, %s4056_s30   ;;  %s3268_s29 = sphi %s3389_s29, %s4059_s29   ;;  %s3264_s28 = sphi %s3387_s28, %s4058_s28   ;;  %s3260_s27 = sphi %s3385_s27, %s4057_s27  }
  0x16   : > { %4010 = sst [smem:[#allocation15_spill]] %s3268_s29  ;;  %s3407_s19 = sadd.s32 1, %s3272_s30  }
  0x17   : > { %4011 = sst [smem:[#allocation16_spill]] %s3407_s19  ;;  %s233_s1 = ssub.s32 %s3272_s30, %s3407_s19 }
  0x18   : > { %s236_s20 = sadd.s32 1, %s3268_s29  ;;  %p234_p0 = scmp.eq.s32.totalorder %s233_s1, 0 }
  0x19   : > { %p243_p1 = scmp.ne.s32.totalorder %s3268_s29, %s3264_s28  ;;  %p244_p2 = scmp.eq.s32.totalorder %s3272_s30, 0 }
  0x1a   : > { %p249_p3 = scmp.ne.s32.totalorder %s3264_s28, %s3260_s27  ;;  %p3984_p5 = scmp.eq.s32.totalorder %s3404_s0, 0 }
  0x1b   : > { %s3417_s21 = scalar_select %p234_p0, %s3268_s29, %s236_s20  }
  0x1c   : > { %p3419_p4 = por %p244_p2, %p243_p1  ;;  %p2657_p6 = scmp.ge.s32.totalorder %s3272_s30, 1 }
  0x1d   : > { %4012 = sst [smem:[#allocation17_spill]] %s3417_s21  ;;  %p515_p7 = scmp.lt.s32.totalorder %s3272_s30, 3 }
  0x1e   : > { %p3428_p8 = por %p3984_p5, %p249_p3  ;;  %s3274_s24 = smov [#allocation2]  }
  0x1f   : > { %p3433_p10 = pnand %p2657_p6, %p515_p7  ;;  %s527_s25 = sshll.u32 %s3274_s24, 4  ;;  %s528_s25 = int_to_ptr.vmem [resolvable:$true] %s527_s25 }
  0x20   : > { %s4014_s2 = scalar_select %p3428_p8, 1, 0 }
  0x21   : > { %s4015_s23 = scalar_select %p3433_p10, 1, 0 }
  0x22   : > { %p2975_p11 = pneg %p3433_p10  ;;  %p2991_p13 = scmp.lt.s32.totalorder %s3272_s30, 2 }
  0x23   : > { %s596_s27 = sand.u32 1, %s3272_s30   ;;  %s598_s1 = sand.u32 1, %s3268_s29  }
  0x24   : > { %p3441_p12 = pnand %p2975_p11, %p3984_p5  ;;  %p3450_p0 = pnand %p2991_p13, %p3419_p4 }
  0x25   : > { %s3105_s24 = scalar_lea.vmem %s528_s25, 256  ;;  %p3113_p7 = scmp.lt.s32.totalorder %s528_s25, %s528_s25 }
  0x26   : > { %p3988_p1 = pneg %p3441_p12  ;;  %p3106_p2 = scmp.ne.s32.totalorder %s528_s25, %s3105_s24 }
  0x27   : > { %p3114_p11 = scmp.lt.s32.totalorder %s3105_s24, %s3105_s24 }
  0x28   : > { %p3108_p3 = pnand %p3106_p2, %p3988_p1 }
  0x29   : > { %p3115_p9 = por %p3114_p11, %p3113_p7 }
  0x2a   : > { %p3109_p6 = pneg %p3108_p3 }
  0x2c   : > { %p3116_p5 = pnand %p3115_p9, %p3109_p6 }
  0x2e   : > { %3119 = shalt.err (!%p3116_p5)
}
  0x2f   : > { %s3991_s21 = smov 128   ;;  %s3276_s22 = smov 8  }
  0x30   : > { %s4018_s18 = sld [smem:[#allocation18_spill]]  ;;  %s3467_s17 = sshll.u32 %s598_s1, 4 }
  0x31   : > { %s2732_s24 = sshll.u32 %s3272_s30, 8  ;;  %s4019_s8 = sld [smem:[#allocation23_spill]] }
  0x32   : > { %s600_s13 = scalar_lea.vmem [#allocation7], %s3467_s17  ;;  %s3480_s10 = scalar_lea.sflag [#allocation3], %s596_s27 }
  0x33   : > { %s607_s11 = sshll.u32 %s600_s13, 4  ;;  %p3122_p5 = pneg %p3450_p0  ;;  %s3478_s11 = int_to_ptr.vmem [resolvable:$true] %s607_s11 }
  0x36   : > { %2978 = dma.hbm_to_vmem [thread:$0]  (!%p3441_p12), %s4018_s18, 256, %s528_s25, [#allocation3], %s3991_s21, %s3991_s21, %s3276_s22  }
  0x37   : > { %s3475_s14 = scalar_lea.hbm %s4019_s8, %s2732_s24  ;;  %s3125_s29 = scalar_lea.hbm %s4019_s8, 512 }
  0x38   : > { %s3120_s18 = scalar_lea.hbm %s3475_s14, 256  ;;  %p3126_p2 = scmp.lt.s32.totalorder %s3475_s14, %s4019_s8 }
  0x39   : > { %p3121_p4 = scmp.ne.s32.totalorder %s3475_s14, %s3120_s18  ;;  %p3127_p3 = scmp.lt.s32.totalorder %s3125_s29, %s3120_s18 }
  0x3b   : > { %p3123_p9 = pnand %p3122_p5, %p3121_p4  ;;  %p3128_p6 = por %p3127_p3, %p3126_p2 }
  0x3d   : > { %p3124_p13 = pneg %p3123_p9 }
  0x3f   : > { %p3129_p7 = pnand %p3128_p6, %p3124_p13 }
  0x41   : > { %3132 = shalt.err (!%p3129_p7)
}
  0x42   : > { %s3133_s13 = scalar_lea.vmem %s3478_s11, 256  ;;  %s3277_s27 = smov [#allocation7]  }
  0x43   : > { %p3134_p11 = scmp.ne.s32.totalorder %s3478_s11, %s3133_s13  ;;  %s3138_s1 = sshll.u32 %s3277_s27, 4  ;;  %s3139_s1 = int_to_ptr.vmem [resolvable:$false] %s3138_s1 }
  0x44   : > { %s3140_s15 = scalar_lea.vmem %s3139_s1, 512  ;;  %p3141_p1 = scmp.lt.s32.totalorder %s3478_s11, %s3139_s1 }
  0x45   : > { %p3136_p4 = pnand %p3134_p11, %p3122_p5  ;;  %p3142_p8 = scmp.lt.s32.totalorder %s3140_s15, %s3133_s13 }
  0x47   : > { %p3137_p9 = pneg %p3136_p4  ;;  %p3143_p10 = por %p3142_p8, %p3141_p1 }
  0x49   : > { %p3144_p2 = pnand %p3143_p10, %p3137_p9 }
  0x4b   : > { %3147 = shalt.err (!%p3144_p2)
}
  0x4c   : > { %s3278_s18 = smov 64   ;;  %s3279_s16 = smov 4  }
  0x4d   : > { %2985 = dma.hbm_to_vmem [thread:$0]  (!%p3450_p0), %s3475_s14, 256, %s3478_s11, %s3480_s10, %s3278_s18, %s3278_s18, %s3279_s16  }
  0x4e   : > { %s3280_s29 = smov [#allocation5]   ;;  %s4020_s12 = sld [smem:[#allocation27_spill]] }
  0x4f   : > { %s540_s19 = sshll.u32 %s3280_s29, 4  ;;  %s639_s1 = scalar_lea.vmem [#allocation8], %s3467_s17  ;;  %s541_s19 = int_to_ptr.vmem [resolvable:$true] %s540_s19 }
  0x50   : > { %s646_s15 = sshll.u32 %s639_s1, 4  ;;  %s3159_s21 = scalar_lea.vmem %s541_s19, 256  ;;  %s647_s15 = int_to_ptr.vmem [resolvable:$true] %s646_s15 }
  0x51   : > { %p3160_p8 = scmp.ne.s32.totalorder %s541_s19, %s3159_s21  ;;  %p4021_p10 = pneg %p3441_p12 }
  0x52   : > { %p3167_p3 = scmp.lt.s32.totalorder %s541_s19, %s541_s19  ;;  %p3168_p6 = scmp.lt.s32.totalorder %s3159_s21, %s3159_s21 }
  0x53   : > { %p3162_p1 = pnand %p3160_p8, %p4021_p10 }
  0x54   : > { %s3515_s27 = scalar_lea.hbm %s4020_s12, %s2732_s24  ;;  %p3169_p7 = por %p3168_p6, %p3167_p3 }
  0x55   : > { %p3163_p13 = pneg %p3162_p1 }
  0x57   : > { %p3170_p11 = pnand %p3169_p7, %p3163_p13 }
  0x59   : > { %3173 = shalt.err (!%p3170_p11)
}
  0x5a   : > { %s4022_s11 = smov 128   ;;  %s4023_s17 = sld [smem:[#allocation19_spill]] }
  0x5b   : > { %s3174_s24 = scalar_lea.hbm %s3515_s27, 256  ;;  %s3179_s29 = scalar_lea.hbm %s4020_s12, 512 }
  0x5c   : > { %p3175_p4 = scmp.ne.s32.totalorder %s3515_s27, %s3174_s24  ;;  %p3180_p8 = scmp.lt.s32.totalorder %s3515_s27, %s4020_s12 }
  0x5d   : > { %p3181_p10 = scmp.lt.s32.totalorder %s3179_s29, %s3174_s24 }
  0x5e   : > { %p3177_p9 = pnand %p3175_p4, %p3122_p5 }
  0x5f   : > { %p3182_p1 = por %p3181_p10, %p3180_p8 }
  0x60   : > { %2981 = dma.hbm_to_vmem [thread:$0]  (!%p3441_p12), %s4023_s17, 256, %s541_s19, [#allocation6], %s4022_s11, %s4022_s11, %s3276_s22  }
  0x61   : > { %p3178_p2 = pneg %p3177_p9 }
  0x63   : > { %p3183_p13 = pnand %p3182_p1, %p3178_p2 }
  0x65   : > { %3186 = shalt.err (!%p3183_p13)
}
  0x66   : > { %s3187_s22 = scalar_lea.vmem %s647_s15, 256  ;;  %s3281_s19 = smov [#allocation8]  }
  0x67   : > { %p3188_p12 = scmp.ne.s32.totalorder %s647_s15, %s3187_s22  ;;  %s3192_s1 = sshll.u32 %s3281_s19, 4  ;;  %s3193_s1 = int_to_ptr.vmem [resolvable:$false] %s3192_s1 }
  0x68   : > { %s3194_s11 = scalar_lea.vmem %s3193_s1, 512  ;;  %p3195_p7 = scmp.lt.s32.totalorder %s647_s15, %s3193_s1 }
  0x69   : > { %p3190_p3 = pnand %p3188_p12, %p3122_p5  ;;  %p3196_p11 = scmp.lt.s32.totalorder %s3194_s11, %s3187_s22 }
  0x6b   : > { %p3191_p6 = pneg %p3190_p3  ;;  %p3197_p4 = por %p3196_p11, %p3195_p7 }
  0x6d   : > { %p3198_p9 = pnand %p3197_p4, %p3191_p6 }
  0x6f   : > { %3201 = shalt.err (!%p3198_p9)
}
  0x70   : > { %2988 = dma.hbm_to_vmem [thread:$0]  (!%p3450_p0), %s3515_s27, 256, %s647_s15, %s3480_s10, %s3278_s18, %s3278_s18, %s3279_s16  }
  0x71   : > { %p4024_p5 = scmp.ne.s32.totalorder %s4015_s23, 0 }
  0x72   : > { %p4025_p2 = scmp.eq.s32.totalorder (!%p4024_p5), %s3404_s0, 0 }
  0x73   : > { %690 = sbr.rel (%p4024_p5) target bundleno = 4251 (0x109b), region = 92 }
  0x78   : > { %3243 = dma.done.wait (%p4025_p2), [#allocation3], 256   ;;  %p4026_p8 = pmov %p4025_p2 }
  0x79   : > { %p4027_p10 = pmov %p4025_p2 }
  0x7a   : > { %3245 = vsyncadd (%p4026_p8), [#allocation3], 4294967040 }
  0x7b   : > { %3247 = dma.done.wait (%p4027_p10), [#allocation6], 256   ;;  %p4028_p1 = pmov %p4025_p2 }
  0x7c   : > { %s700_s20 = sand.u32 1, %s3404_s0   ;;  %s702_s10 = sand.u32 1, %s3264_s28  }
  0x7d   : > { %3249 = vsyncadd (%p4028_p1), [#allocation6], 4294967040  ;;  %s3563_s18 = sshll.u32 %s702_s10, 4  ;;  %s701_s23 = scalar_lea.sflag [#allocation3], %s700_s20 }
  0x7e   : > { %s3566_s16 = scalar_lea.vmem [#allocation7], %s3563_s18  ;;  %p4029_p0 = scmp.ne.s32.totalorder %s4014_s2, 0 }
  0x80   : > { %3251 = dma.done.wait (%p4029_p0), %s701_s23, 512  }
  0x81   : > { %3253 = vsyncadd (%p4029_p0), %s701_s23, 4294966784  ;;  %p816_p13 = scmp.lt.s32.totalorder %s3404_s0, 1  ;;  %s4030_s21 = sld [smem:[#allocation20_spill]] }
  0x82   : > { %s4031_s4 = sld [smem:[#allocation21_spill]]  ;;  %s713_s12 = scalar_lea.vmem [#allocation8], %s3563_s18 }
  0x83   : > { %s3574_s27 = scalar_select %p816_p13, %s3404_s0, 1 }
  0x84   : > { %s4032_s6 = sld [smem:[#allocation22_spill]]  ;;  %p4041_p12 = scmp.ne.s32.totalorder %s3404_s0, 0 }
  0x85   : > { %s2734_s15 = sshll.u32 %s3574_s27, 4  ;;  %s4037_s2 = sld [smem:[#allocation29_spill]] }
  0x86   : > { %s4039_s25 = sld [smem:[#allocation31_spill]] }
  0x87   : > { %s820_s26 = scalar_lea.vmem %s4030_s21, %s2734_s15  ;;  %s4038_s21 = sld [smem:[#allocation30_spill]] }
  0x88   : > { %s3587_s13 = scalar_lea.vmem %s4031_s4, %s2734_s15  ;;  %s4040_s19 = sld [smem:[#allocation32_spill]] }
  0x8a   : > { %s3596_s10 = scalar_lea.vmem %s4032_s6, %s2734_s15  ;;  %s4036_s15 = sld [smem:[#allocation28_spill]] }
  0x8b   : > { %s2737_s6 = sshll.u32 %s3574_s27, 5 }
  0x8c   : > { %s3622_s14 = scalar_lea.vmem %s4037_s2, %s2737_s6  ;;  %s862_s4 = scalar_lea.vmem %s4039_s25, %s3574_s27 }
  0x8d   : > { %s859_s9 = scalar_lea.vmem %s4038_s21, %s3574_s27  ;;  %870 = sbr.rel (%p4041_p12) target bundleno = 151 (0x97), region = 112 }
  0x8e   : > { %s865_s1 = scalar_lea.vmem %s4040_s19, %s3574_s27 }
  0x90   : > { %s851_s20 = scalar_lea.vmem %s4036_s15, %s3574_s27 }
  0x92   : > { %v871_v0 = vld [vmem:[#allocation2] sm:$0xff]  ;;  %v873_v1 = vld [vmem:[#allocation5] sm:$0xff]  ;;  %vm877_vm0 = vcmask 261120   ;;  %v872_v2 = vld [vmem:[#allocation2 + $0x8] sm:$0xff] }
  0x93   : > { %v875_v3 = vadd.f32 %v873_v1, %v871_v0  ;;  %v874_v4 = vld [vmem:[#allocation5 + $0x8] sm:$0xff] }
  0x94   : > { %v876_v5 = vadd.f32 %v874_v4, %v872_v2 }
  0x95   : > { %878 = vst.msk [vmem:[#allocation9] sm:$0xff] %vm877_vm0, %v875_v3 }
  0x96   : > { %879 = vst.msk [vmem:[#allocation9 + $0x8] sm:$0xff] %vm877_vm0, %v876_v5 }
  0x97 PF: > { %v3042_v6 = vld [vmem:[%s820_s26 + $0x8] sm:$0xff]   ;;  %v3282_v7 = vmov 0.0   ;;  %v3043_v8 = vld [vmem:[%s820_s26] sm:$0xff]   ;;  %vm3283_vm1 = vmmov 0   ;;  %vm906_vm2 = vcmask 261120   ;;  %s4042_s26 = scalar_lea.vmem %s3970_s5, %s3574_s27  ;;  %vm1089_vm3 = vcmask 64512   ;;  %s4043_s21 = scalar_lea.vmem %s3968_s3, %s3574_s27 }
  0x98   : > { %2795 = vmatprep.subr.bf16.mxu1 %v3282_v7  ;;  %2811 = vmatprep.subr.bf16.mxu0 %v3282_v7  ;;  %v3044_v11 = vld [vmem:[%s3587_s13 + $0x8] sm:$0xff]   ;;  %v3045_v13 = vld [vmem:[%s3587_s13] sm:$0xff]   ;;  %s3284_s11 = smov 120   ;;  %s4044_s2 = scalar_lea.vmem %s3972_s7, %s3574_s27  ;;  %vm1209_vm4 = vcmask 1043456   ;;  %vm2327_vm5 = vcmask 523264  }
  0x99   : > { %2796 = vmatpush3.bf16.msra.mxu1 %v3042_v6  ;;  %2799 = vmatprep.mubr.msk.bf16.mxu1 %vm3283_vm1, %v3282_v7  ;;  %v3046_v14 = vld [vmem:[%s3596_s10 + $0x8] sm:$0xff]   ;;  %v3047_v15 = vld [vmem:[%s3596_s10] sm:$0xff]   ;;  %s3285_s17 = smov 112   ;;  %s3286_s24 = smov 104  }
  0x9a   : > { %2797 = vmatprep.subr.bf16.mxu1 %v3282_v7  ;;  %2815 = vmatprep.mubr.msk.bf16.mxu0 %vm3283_vm1, %v3282_v7  ;;  %v2685_v20 = vld [vmem:[%s4042_s26] ss:$0 sm:$0xff]  ;;  %s4045_s30 = sld [smem:[#allocation24_spill]]  ;;  %p2994_p3 = scmp.eq.s32.totalorder %s3404_s0, 1 }
  0x9b   : > { %2812 = vmatpush3.bf16.msra.mxu0 %v3046_v14  ;;  %v2681_v25 = vld [vmem:[%s4043_s21] ss:$0 sm:$0xff]  ;;  %s4047_s22 = sld [smem:[#allocation25_spill]] }
  0x9c   : > { %v3643_v9 = vld [vmem:[#allocation9] sm:$0xff]  ;;  %2813 = vmatprep.subr.bf16.mxu0 %v3282_v7  ;;  %s4049_s28 = sld [smem:[#allocation26_spill]] }
  0x9d   : > { %v3645_v10 = vld [vmem:[#allocation9 + $0x8] sm:$0xff]  ;;  %2798 = vmatpush3.bf16.msra.mxu1 %v3043_v8  ;;  %v2689_v36 = vld [vmem:[%s4044_s2] ss:$0 sm:$0xff] }
  0x9e   : > { %v882_v12 = vpack.c.bf16 %v3645_v10, %v3643_v9  ;;  %2803 = vmatprep.subr.bf16.mxu1 %v3282_v7 }
  0x9f   : > { %2814 = vmatpush3.bf16.msra.mxu0 %v3047_v15 }
  0xa0   : > { %2800 = vmatmul.mubr.msk.bf16.vlgmr.msra.gmra.mxu1 %vm906_vm2, %v882_v12  ;;  %2825 = vmatprep.subr.bf16.mxu0 %v3282_v7  ;;  %s4046_s25 = scalar_lea.vmem %s4045_s30, %s3574_s27 }
  0xa1   : > { %2804 = vmatpush3.bf16.msra.mxu1 %v3044_v11  ;;  %2807 = vmatprep.mubr.msk.bf16.mxu1 %vm3283_vm1, %v3282_v7  ;;  %s4048_s19 = scalar_lea.vmem %s4047_s22, %s3574_s27 }
  0xa2   : > { %2805 = vmatprep.subr.bf16.mxu1 %v3282_v7  ;;  %2816 = vmatmul.mubr.msk.bf16.vlgmr.msra.gmra.mxu0 %vm906_vm2, %v882_v12  ;;  %s4050_s26 = scalar_lea.vmem %s4049_s28, %s3574_s27 }
  0xa3   : > { %2827 = vmatprep.mubr.msk.bf16.mxu0 %vm3283_vm1, %v3282_v7 }
  0xa5   : > { %2806 = vmatpush3.bf16.msra.mxu1 %v3045_v13 }
  0xa6   : > { %2819 = vmatprep.subr.bf16.mxu1 %v3282_v7 }
  0xa8   : > { %2808 = vmatmul.mubr.msk.bf16.vlgmr.msra.gmra.mxu1 %vm906_vm2, %v882_v12 }
  0xa9   : > { %2821 = vmatprep.mubr.msk.bf16.mxu1 %vm3283_vm1, %v3282_v7 }
 0x160   : > { %v944_v16 = vpop.f32.mrf.mxu1 }
 0x161   : > { %v945_v30 = vadd.f32 %v2681_v25, %v944_v16 }
 0x162   : > { %v2801_v17 = vpop.f32.mrf.mxu1  ;;  %v1072_v37 = vpop.f32.mrf.mxu0 }
 0x163   : > { %v3691_v33 = vpack.c.bf16 %v945_v30, %v945_v30  ;;  %v1073_v39 = vadd.f32 %v2689_v36, %v1072_v37 }
 0x164   : > { %v947_v18 = vpop.f32.mrf.mxu1  ;;  %v2817_v38 = vpop.f32.mrf.mxu0 }
 0x165   : > { %v948_v34 = vadd.f32 %v2681_v25, %v947_v18  ;;  %v3709_v43 = vpack.c.bf16 %v1073_v39, %v1073_v39 }
 0x166   : > { %v2802_v19 = vpop.f32.mrf.mxu1  ;;  %v1075_v40 = vpop.f32.mrf.mxu0 }
 0x167   : > { %v3698_v35 = vpack.c.bf16 %v948_v34, %v948_v34  ;;  %v1076_v41 = vadd.f32 %v2689_v36, %v1075_v40  ;;  %v1211_v45 = vsel %vm1209_vm4, %v3709_v43, 0 }
 0x168   : > { %v1008_v21 = vpop.f32.mrf.mxu1  ;;  %v2818_v42 = vpop.f32.mrf.mxu0 }
 0x169   : > { %v1009_v22 = vadd.f32 %v2685_v20, %v1008_v21  ;;  %v3711_v44 = vpack.c.bf16 %v1076_v41, %v1076_v41 }
 0x16a   : > { %v2809_v23 = vpop.f32.mrf.mxu1 }
 0x16b   : > { %v3675_v24 = vpack.c.bf16 %v1009_v22, %v1009_v22  ;;  %v1257_v46 = vsel %vm1209_vm4, %v3711_v44, 0 }
 0x16c   : > { %v1011_v26 = vpop.f32.mrf.mxu1 }
 0x16d   : > { %v1012_v27 = vadd.f32 %v2685_v20, %v1011_v26  ;;  %v1094_v28 = vsel %vm1089_vm3, %v3675_v24, 0 }
 0x16e   : > { %v2810_v29 = vpop.f32.mrf.mxu1  ;;  %2820 = vmatpush3.bf16.xpose.msra.mxu1 %v1094_v28 }
 0x16f   : > { %v3684_v31 = vpack.c.bf16 %v1012_v27, %v1012_v27  ;;  %2831 = vmatprep.subr.bf16.mxu1 %v3282_v7 }
 0x171   : > { %1356 = vrot.lane.b32.xlu1 %v3684_v31, %s3284_s11  ;;  %v1140_v32 = vsel %vm1089_vm3, %v3684_v31, 0 }
 0x172   : > { %2826 = vmatpush3.bf16.xpose.msra.mxu0 %v1140_v32 }
 0x173   : > { %2837 = vmatprep.subr.bf16.mxu0 %v3282_v7 }
 0x175   : > { %2822 = vmatmul.mubr.msk.bf16.vlgmr.msra.gmra.mxu1 %vm1089_vm3, %v3691_v33 }
 0x176   : > { %2833 = vmatprep.mubr.msk.bf16.mxu1 %vm3283_vm1, %v3282_v7  ;;  %2832 = vmatpush3.bf16.msra.mxu1 %v1211_v45 }
 0x177   : > { %2843 = vmatprep.subr.bf16.mxu1 %v3282_v7 }
 0x179   : > { %2828 = vmatmul.mubr.msk.bf16.vlgmr.msra.gmra.mxu0 %vm1089_vm3, %v3698_v35 }
 0x17a   : > { %2839 = vmatprep.mubr.msk.bf16.mxu0 %vm3283_vm1, %v3282_v7  ;;  %2838 = vmatpush3.bf16.msra.mxu0 %v1257_v46 }
 0x17b   : > { %2849 = vmatprep.subr.bf16.mxu0 %v3282_v7 }
 0x1e3   : > { %v1357_v3 = vpop.permute.xlu1 %1356 }
 0x1e4   : > { %v1362_v17 = vsel %vm1089_vm3, %v1357_v3, 0 }
 0x235   : > { %v1130_v47 = vpop.f32.mrf.mxu1 }
 0x236   : > { %v1182_v48 = vsel %vm1089_vm3, %v1130_v47, -inf }
 0x237   : > { %1183 = vmax.xlane.f32.xlu0 %v1182_v48  ;;  %v2823_v49 = vpop.f32.mrf.mxu1 }
 0x239   : > { %v1133_v50 = vpop.f32.mrf.mxu1  ;;  %v1176_v51 = vpop.f32.mrf.mxu0 }
 0x23a   : > { %v1185_v52 = vsel %vm1089_vm3, %v1176_v51, -inf }
 0x23b   : > { %v2829_v53 = vpop.f32.mrf.mxu0  ;;  %1186 = vmax.xlane.f32.xlu0 %v1185_v52  ;;  %v2824_v54 = vpop.f32.mrf.mxu1 }
 0x23d   : > { %v1179_v55 = vpop.f32.mrf.mxu0 }
 0x23f   : > { %v2830_v56 = vpop.f32.mrf.mxu0 }
 0x251   : > { %1304 = vrot.lane.b32.xlu0 %v3675_v24, %s3284_s11 }
 0x2c0   : > { %v1184_v57 = vpop.xlane.xlu0 %1183 }
 0x2c1   : > { %v1188_v58 = vsub.f32 %v1130_v47, %v1184_v57 }
 0x2c3   : > { %v1190_v59 = vmul.f32 1.442695, %v1188_v58 }
 0x2c4   : > { %v1187_v60 = vpop.xlane.xlu0 %1186 }
 0x2c5   : > { %3054 = vpow2.f32 %v1190_v59  ;;  %v1189_v61 = vsub.f32 %v1176_v51, %v1187_v60 }
 0x2c7   : > { %v1192_v62 = vmul.f32 1.442695, %v1189_v61 }
 0x2c8   : > { %v1305_v11 = vpop.permute.xlu0 %1304 }
 0x2c9   : > { %3056 = vpow2.f32 %v1192_v62  ;;  %v1310_v14 = vsel %vm1089_vm3, %v1305_v11, 0 }
 0x2d2   : > { %v3055_v63 = vpop.eup %3054 }
 0x2d3   : > { %v1194_v0 = vsel %vm1089_vm3, %v3055_v63, 0.0 }
 0x2d4   : > { %1195 = vadd.xlane.f32.xlu1 %v1194_v0 }
 0x2d6   : > { %v3057_v1 = vpop.eup %3056 }
 0x2d7   : > { %v1197_v2 = vsel %vm1089_vm3, %v3057_v1, 0.0 }
 0x2d8   : > { %1198 = vadd.xlane.f32.xlu1 %v1197_v2 }
 0x2e9   : > { %1301 = vrot.lane.b32.xlu1 %v3691_v33, %s3284_s11 }
 0x2ed   : > { %1353 = vrot.lane.b32.xlu1 %v3698_v35, %s3284_s11 }
 0x35d   : > { %v1196_v4 = vpop.xlane.xlu1 %1195 }
 0x35e   : > { %3058 = vrcp.f32 %v1196_v4 }
 0x361   : > { %v1199_v5 = vpop.xlane.xlu1 %1198 }
 0x362   : > { %3060 = vrcp.f32 %v1199_v5 }
 0x365   : > { %v1302_v18 = vpop.permute.xlu1 %1301 }
 0x369   : > { %v1354_v19 = vpop.permute.xlu1 %1353 }
 0x36b   : > { %v3059_v6 = vpop.eup %3058 }
 0x36c   : > { %v1202_v8 = vmul.f32 %v3059_v6, %v3055_v63 }
 0x36e   : > { %v1204_v12 = vpack.c.bf16 %v1202_v8, %v1202_v8 }
 0x36f   : > { %v3061_v13 = vpop.eup %3060 }
 0x370   : > { %2834 = vmatmul.mubr.msk.bf16.vlgmr.msra.gmra.mxu1 %vm1089_vm3, %v1204_v12  ;;  %v1203_v15 = vmul.f32 %v3061_v13, %v3057_v1  ;;  %v1085_v1 = vld [vmem:[%s3566_s16] sm:$0xf]  ;;  %v1086_v12 = vld [vmem:[%s3566_s16 + $0x4] sm:$0xf] }
 0x371   : > { %2844 = vmatpush3.bf16.xpose.msra.mxu1 %v1310_v14  ;;  %2845 = vmatprep.mubr.msk.bf16.mxu1 %vm3283_vm1, %v3282_v7  ;;  %v1578_v4 = vsel %vm1209_vm4, %v1085_v1, 0  ;;  %v1531_v13 = vsel %vm1209_vm4, %v1086_v12, 0 }
 0x372   : > { %v1205_v16 = vpack.c.bf16 %v1203_v15, %v1203_v15  ;;  %2855 = vmatprep.subr.bf16.mxu1 %v3282_v7 }
 0x374   : > { %2840 = vmatmul.mubr.msk.bf16.vlgmr.msra.gmra.mxu0 %vm1089_vm3, %v1205_v16 }
 0x375   : > { %2850 = vmatpush3.bf16.xpose.msra.mxu0 %v1362_v17  ;;  %2851 = vmatprep.mubr.msk.bf16.mxu0 %vm3283_vm1, %v3282_v7 }
 0x376   : > { %2861 = vmatprep.subr.bf16.mxu0 %v3282_v7 }
 0x378   : > { %2846 = vmatmul.mubr.msk.bf16.vlgmr.msra.gmra.mxu1 %vm1089_vm3, %v1302_v18 }
 0x379   : > { %2857 = vmatprep.mubr.msk.bf16.mxu1 %vm3283_vm1, %v3282_v7 }
 0x37c   : > { %2852 = vmatmul.mubr.msk.bf16.vlgmr.msra.gmra.mxu0 %vm1089_vm3, %v1354_v19 }
 0x37d   : > { %2863 = vmatprep.mubr.msk.bf16.mxu0 %vm3283_vm1, %v3282_v7 }
 0x430   : > { %v3745_v20 = vpop.f32.mrf.mxu1 }
 0x432   : > { %v2835_v21 = vpop.f32.mrf.mxu1 }
 0x434   : > { %v1250_v22 = vpop.f32.mrf.mxu1  ;;  %v3747_v23 = vpop.f32.mrf.mxu0 }
 0x435   : > { %v1299_v25 = vpack.c.bf16 %v3747_v23, %v3745_v20 }
 0x436   : > { %v2836_v26 = vpop.f32.mrf.mxu1  ;;  %v2841_v27 = vpop.f32.mrf.mxu0 }
 0x438   : > { %v1296_v28 = vpop.f32.mrf.mxu0  ;;  %v1346_v29 = vpop.f32.mrf.mxu1 }
 0x439   : > { %v1404_v30 = vsel %vm1089_vm3, %v1346_v29, -inf }
 0x43a   : > { %v2842_v32 = vpop.f32.mrf.mxu0  ;;  %1405 = vmax.xlane.f32.xlu0 %v1404_v30  ;;  %v2847_v34 = vpop.f32.mrf.mxu1 }
 0x43c   : > { %v1349_v36 = vpop.f32.mrf.mxu1  ;;  %v1398_v37 = vpop.f32.mrf.mxu0 }
 0x43d   : > { %v1407_v38 = vsel %vm1089_vm3, %v1398_v37, -inf }
 0x43e   : > { %1408 = vmax.xlane.f32.xlu1 %v1407_v38  ;;  %v2848_v39 = vpop.f32.mrf.mxu1  ;;  %v2853_v40 = vpop.f32.mrf.mxu0 }
 0x440   : > { %v1401_v41 = vpop.f32.mrf.mxu0 }
 0x442   : > { %v2854_v42 = vpop.f32.mrf.mxu0 }
 0x44f   : > { %1478 = vrot.lane.b32.xlu1 %v3711_v44, %s3284_s11 }
 0x453   : > { %1623 = vrot.lane.b32.xlu1 %v3675_v24, %s3285_s17 }
 0x457   : > { %1673 = vrot.lane.b32.xlu1 %v3684_v31, %s3285_s17 }
 0x45b   : > { %1671 = vrot.lane.b32.xlu1 %v3698_v35, %s3285_s17 }
 0x4c3   : > { %v1406_v45 = vpop.xlane.xlu0 %1405 }
 0x4c4   : > { %v1410_v46 = vsub.f32 %v1346_v29, %v1406_v45 }
 0x4c6   : > { %v1412_v47 = vmul.f32 1.442695, %v1410_v46 }
 0x4c7   : > { %v1409_v48 = vpop.xlane.xlu1 %1408 }
 0x4c8   : > { %3062 = vpow2.f32 %v1412_v47  ;;  %v1411_v49 = vsub.f32 %v1398_v37, %v1409_v48 }
 0x4ca   : > { %v1414_v50 = vmul.f32 1.442695, %v1411_v49 }
 0x4cb   : > { %v1479_v51 = vpop.permute.xlu1 %1478 }
 0x4cc   : > { %3064 = vpow2.f32 %v1414_v50  ;;  %v1484_v52 = vsel %vm1209_vm4, %v1479_v51, 0 }
 0x4cd   : > { %2862 = vmatpush3.bf16.msra.mxu0 %v1484_v52 }
 0x4ce   : > { %2873 = vmatprep.subr.bf16.mxu0 %v3282_v7 }
 0x4cf   : > { %v1624_v5 = vpop.permute.xlu1 %1623 }
 0x4d0   : > { %v1629_v21 = vsel %vm1089_vm3, %v1624_v5, 0 }
 0x4d3   : > { %v1674_v6 = vpop.permute.xlu1 %1673 }
 0x4d4   : > { %v1679_v8 = vsel %vm1089_vm3, %v1674_v6, 0 }
 0x4d5   : > { %v3063_v53 = vpop.eup %3062 }
 0x4d6   : > { %v1416_v54 = vsel %vm1089_vm3, %v3063_v53, 0.0 }
 0x4d7   : > { %1417 = vadd.xlane.f32.xlu0 %v1416_v54  ;;  %v1672_v11 = vpop.permute.xlu1 %1671 }
 0x4d9   : > { %v3065_v55 = vpop.eup %3064 }
 0x4da   : > { %v1419_v56 = vsel %vm1089_vm3, %v3065_v55, 0.0 }
 0x4db   : > { %1420 = vadd.xlane.f32.xlu0 %v1419_v56 }
 0x4f1   : > { %1429 = vrot.lane.b32.xlu0 %v3709_v43, %s3284_s11 }
 0x4f5   : > { %1621 = vrot.lane.b32.xlu0 %v3691_v33, %s3285_s17 }
 0x560   : > { %v1418_v57 = vpop.xlane.xlu0 %1417 }
 0x561   : > { %3066 = vrcp.f32 %v1418_v57 }
 0x564   : > { %v1421_v58 = vpop.xlane.xlu0 %1420 }
 0x565   : > { %3068 = vrcp.f32 %v1421_v58 }
 0x568   : > { %v1430_v59 = vpop.permute.xlu0 %1429 }
 0x569   : > { %v1435_v60 = vsel %vm1209_vm4, %v1430_v59, 0 }
 0x56a   : > { %2856 = vmatpush3.bf16.msra.mxu1 %v1435_v60 }
 0x56b   : > { %2867 = vmatprep.subr.bf16.mxu1 %v3282_v7 }
 0x56c   : > { %v1622_v26 = vpop.permute.xlu0 %1621 }
 0x56e   : > { %v3067_v61 = vpop.eup %3066 }
 0x56f   : > { %v1424_v62 = vmul.f32 %v3067_v61, %v3063_v53 }
 0x571   : > { %v1426_v63 = vpack.c.bf16 %v1424_v62, %v1424_v62 }
 0x572   : > { %v3069_v0 = vpop.eup %3068 }
 0x573   : > { %2858 = vmatmul.mubr.msk.bf16.vlgmr.msra.gmra.mxu1 %vm1089_vm3, %v1426_v63  ;;  %v1425_v2 = vmul.f32 %v3069_v0, %v3065_v55 }
 0x574   : > { %2869 = vmatprep.mubr.msk.bf16.mxu1 %vm3283_vm1, %v3282_v7  ;;  %2868 = vmatpush3.bf16.msra.mxu1 %v1531_v13  ;;  %v1087_v13 = vld [vmem:[%s3566_s16 + $0x8] sm:$0xf] }
 0x575   : > { %v1427_v3 = vpack.c.bf16 %v1425_v2, %v1425_v2  ;;  %2879 = vmatprep.subr.bf16.mxu1 %v3282_v7 }
 0x577   : > { %2864 = vmatmul.mubr.msk.bf16.vlgmr.msra.gmra.mxu0 %vm1089_vm3, %v1427_v3 }
 0x578   : > { %2874 = vmatpush3.bf16.msra.mxu0 %v1578_v4  ;;  %2875 = vmatprep.mubr.msk.bf16.mxu0 %vm3283_vm1, %v3282_v7 }
 0x579   : > { %2885 = vmatprep.subr.bf16.mxu0 %v3282_v7 }
 0x57f   : > { %2876 = vmatmul.mubr.msk.bf16.vlgmr.msra.gmra.mxu0 %vm1089_vm3, %v1299_v25 }
 0x580   : > { %2886 = vmatpush3.bf16.xpose.msra.mxu0 %v1679_v8  ;;  %2887 = vmatprep.mubr.msk.bf16.mxu0 %vm3283_vm1, %v3282_v7 }
 0x581   : > { %2897 = vmatprep.subr.bf16.mxu0 %v3282_v7 }
 0x587   : > { %2888 = vmatmul.mubr.msk.bf16.vlgmr.msra.gmra.mxu0 %vm1089_vm3, %v1672_v11 }
 0x588   : > { %2899 = vmatprep.mubr.msk.bf16.mxu0 %vm3283_vm1, %v3282_v7 }
 0x633   : > { %v1471_v14 = vpop.f32.mrf.mxu1 }
 0x635   : > { %v2859_v15 = vpop.f32.mrf.mxu1 }
 0x637   : > { %v1474_v16 = vpop.f32.mrf.mxu1  ;;  %v1520_v17 = vpop.f32.mrf.mxu0 }
 0x638   : > { %v1526_v18 = vpack.c.bf16 %v1520_v17, %v1471_v14  ;;  %v1846_v14 = vsel %vm1209_vm4, %v1087_v13, 0 }
 0x639   : > { %v2860_v19 = vpop.f32.mrf.mxu1  ;;  %v2865_v20 = vpop.f32.mrf.mxu0 }
 0x63a   : > { %2870 = vmatmul.mubr.msk.bf16.vlgmr.msra.gmra.mxu1 %vm1089_vm3, %v1526_v18 }
 0x63b   : > { %2880 = vmatpush3.bf16.xpose.msra.mxu1 %v1629_v21  ;;  %v1523_v22 = vpop.f32.mrf.mxu0  ;;  %2881 = vmatprep.mubr.msk.bf16.mxu1 %vm3283_vm1, %v3282_v7 }
 0x63c   : > { %2891 = vmatprep.subr.bf16.mxu1 %v3282_v7 }
 0x63d   : > { %v2866_v23 = vpop.f32.mrf.mxu0 }
 0x63f   : > { %v3799_v25 = vpop.f32.mrf.mxu0 }
 0x641   : > { %v2877_v27 = vpop.f32.mrf.mxu0 }
 0x642   : > { %2882 = vmatmul.mubr.msk.bf16.vlgmr.msra.gmra.mxu1 %vm1089_vm3, %v1622_v26 }
 0x643   : > { %v3802_v28 = vpop.f32.mrf.mxu0  ;;  %2893 = vmatprep.mubr.msk.bf16.mxu1 %vm3283_vm1, %v3282_v7 }
 0x645   : > { %v2878_v29 = vpop.f32.mrf.mxu0 }
 0x647   : > { %v1715_v30 = vpop.f32.mrf.mxu0 }
 0x648   : > { %v1724_v32 = vsel %vm1089_vm3, %v1715_v30, -inf }
 0x649   : > { %1725 = vmax.xlane.f32.xlu1 %v1724_v32  ;;  %v2889_v34 = vpop.f32.mrf.mxu0 }
 0x64b   : > { %v1718_v36 = vpop.f32.mrf.mxu0 }
 0x64d   : > { %v2890_v37 = vpop.f32.mrf.mxu0 }
 0x65a   : > { %1793 = vrot.lane.b32.xlu1 %v3711_v44, %s3285_s17 }
 0x65e   : > { %1893 = vrot.lane.b32.xlu1 %v3675_v24, %s3286_s24 }
 0x662   : > { %1943 = vrot.lane.b32.xlu1 %v3684_v31, %s3286_s24 }
 0x666   : > { %1941 = vrot.lane.b32.xlu1 %v3698_v35, %s3286_s24 }
 0x6d2   : > { %v1726_v38 = vpop.xlane.xlu1 %1725 }
 0x6d3   : > { %v1728_v41 = vsub.f32 %v1715_v30, %v1726_v38 }
 0x6d5   : > { %v1731_v42 = vmul.f32 1.442695, %v1728_v41 }
 0x6d6   : > { %v1794_v39 = vpop.permute.xlu1 %1793 }
 0x6d7   : > { %v1799_v40 = vsel %vm1209_vm4, %v1794_v39, 0  ;;  %3070 = vpow2.f32 %v1731_v42 }
 0x6d8   : > { %2898 = vmatpush3.bf16.msra.mxu0 %v1799_v40 }
 0x6d9   : > { %2909 = vmatprep.subr.bf16.mxu0 %v3282_v7 }
 0x6da   : > { %v1894_v61 = vpop.permute.xlu1 %1893 }
 0x6db   : > { %v1899_v63 = vsel %vm1089_vm3, %v1894_v61, 0 }
 0x6de   : > { %v1944_v20 = vpop.permute.xlu1 %1943 }
 0x6df   : > { %v1949_v26 = vsel %vm1089_vm3, %v1944_v20, 0 }
 0x6e2   : > { %v1942_v30 = vpop.permute.xlu1 %1941 }
 0x6e4   : > { %v3071_v35 = vpop.eup %3070 }
 0x6e5   : > { %v1736_v51 = vsel %vm1089_vm3, %v3071_v35, 0.0 }
 0x6fa   : > { %v3817_v45 = vpop.f32.mrf.mxu1 }
 0x6fb   : > { %v1615_v39 = vadd.f32 %v3799_v25, %v3817_v45 }
 0x6fc   : > { %v2871_v46 = vpop.f32.mrf.mxu1 }
 0x6fe   : > { %v3819_v24 = vpop.f32.mrf.mxu1 }
 0x6ff   : > { %v1618_v46 = vadd.f32 %v3802_v28, %v3819_v24 }
 0x700   : > { %v2872_v47 = vpop.f32.mrf.mxu1 }
 0x702   : > { %v1665_v31 = vpop.f32.mrf.mxu1 }
 0x703   : > { %v1721_v48 = vsel %vm1089_vm3, %v1665_v31, -inf }
 0x704   : > { %1722 = vmax.xlane.f32.xlu0 %v1721_v48  ;;  %v2883_v49 = vpop.f32.mrf.mxu1 }
 0x706   : > { %v1668_v50 = vpop.f32.mrf.mxu1 }
 0x708   : > { %1737 = vadd.xlane.f32.xlu0 %v1736_v51  ;;  %v2884_v52 = vpop.f32.mrf.mxu1 }
 0x78d   : > { %v1723_v53 = vpop.xlane.xlu0 %1722 }
 0x78e   : > { %v1727_v54 = vsub.f32 %v1665_v31, %v1723_v53 }
 0x790   : > { %v1729_v55 = vmul.f32 1.442695, %v1727_v54 }
 0x791   : > { %v1738_v56 = vpop.xlane.xlu0 %1737 }
 0x792   : > { %3072 = vpow2.f32 %v1729_v55 }
 0x793   : > { %3074 = vrcp.f32 %v1738_v56 }
 0x79f   : > { %v3073_v57 = vpop.eup %3072 }
 0x7a0   : > { %v3075_v58 = vpop.eup %3074  ;;  %v1733_v59 = vsel %vm1089_vm3, %v3073_v57, 0.0 }
 0x7a1   : > { %1734 = vadd.xlane.f32.xlu0 %v1733_v59  ;;  %v1742_v60 = vmul.f32 %v3075_v58, %v3071_v35 }
 0x7a3   : > { %v1744_v62 = vpack.c.bf16 %v1742_v60, %v1742_v60 }
 0x7a5   : > { %2900 = vmatmul.mubr.msk.bf16.vlgmr.msra.gmra.mxu0 %vm1089_vm3, %v1744_v62 }
 0x7a6   : > { %2910 = vmatpush3.bf16.xpose.msra.mxu0 %v1899_v63  ;;  %2911 = vmatprep.mubr.msk.bf16.mxu0 %vm3283_vm1, %v3282_v7 }
 0x7a7   : > { %2921 = vmatprep.subr.bf16.mxu0 %v3282_v7 }
 0x7b7   : > { %1745 = vrot.lane.b32.xlu0 %v3709_v43, %s3285_s17 }
 0x7bb   : > { %1891 = vrot.lane.b32.xlu0 %v3691_v33, %s3286_s24 }
 0x82a   : > { %v1735_v0 = vpop.xlane.xlu0 %1734 }
 0x82b   : > { %3076 = vrcp.f32 %v1735_v0  ;;  %v1088_v0 = vld [vmem:[%s3566_s16 + $0xc] sm:$0xf]  ;;  %s3287_s16 = smov [#allocation9]  }
 0x82c   : > { %s2426_s29 = sshll.u32 %s3287_s16, 4  ;;  %s2427_s29 = int_to_ptr.vmem [resolvable:$true] %s2426_s29 }
 0x82d   : > { %p3209_p4 = scmp.lt.s32.totalorder %s2427_s29, %s2427_s29 }
 0x82e   : > { %v1746_v1 = vpop.permute.xlu0 %1745 }
 0x82f   : > { %v1751_v2 = vsel %vm1209_vm4, %v1746_v1, 0  ;;  %v2116_v1 = vsel %vm1209_vm4, %v1088_v0, 0 }
 0x830   : > { %2892 = vmatpush3.bf16.msra.mxu1 %v1751_v2 }
 0x831   : > { %2903 = vmatprep.subr.bf16.mxu1 %v3282_v7 }
 0x832   : > { %v1892_v3 = vpop.permute.xlu0 %1891 }
 0x833   : > { %2912 = vmatmul.mubr.msk.bf16.vlgmr.msra.gmra.mxu0 %vm1089_vm3, %v1892_v3 }
 0x834   : > { %2923 = vmatprep.mubr.msk.bf16.mxu0 %vm3283_vm1, %v3282_v7 }
 0x838   : > { %v3077_v4 = vpop.eup %3076 }
 0x839   : > { %v1741_v5 = vmul.f32 %v3077_v4, %v3073_v57 }
 0x83b   : > { %v1743_v6 = vpack.c.bf16 %v1741_v5, %v1741_v5 }
 0x83d   : > { %2894 = vmatmul.mubr.msk.bf16.vlgmr.msra.gmra.mxu1 %vm1089_vm3, %v1743_v6 }
 0x83e   : > { %2905 = vmatprep.mubr.msk.bf16.mxu1 %vm3283_vm1, %v3282_v7  ;;  %2904 = vmatpush3.bf16.msra.mxu1 %v1846_v14  ;;  %v2713_v14 = vld [vmem:[%s4046_s25] ss:$0 sm:$0xff] }
 0x83f   : > { %2915 = vmatprep.subr.bf16.mxu1 %v3282_v7 }
 0x865   : > { %v1835_v33 = vpop.f32.mrf.mxu0 }
 0x867   : > { %v2901_v8 = vpop.f32.mrf.mxu0 }
 0x869   : > { %v1838_v11 = vpop.f32.mrf.mxu0 }
 0x86b   : > { %v2902_v12 = vpop.f32.mrf.mxu0 }
 0x8f3   : > { %v1935_v15 = vpop.f32.mrf.mxu0 }
 0x8f4   : > { %v1991_v16 = vsel %vm1089_vm3, %v1935_v15, -inf }
 0x8f5   : > { %1992 = vmax.xlane.f32.xlu0 %v1991_v16  ;;  %v2913_v17 = vpop.f32.mrf.mxu0 }
 0x8f7   : > { %v1938_v18 = vpop.f32.mrf.mxu0 }
 0x8f9   : > { %v2914_v19 = vpop.f32.mrf.mxu0 }
 0x8fd   : > { %v1787_v21 = vpop.f32.mrf.mxu1 }
 0x8fe   : > { %v1841_v22 = vpack.c.bf16 %v1835_v33, %v1787_v21 }
 0x8ff   : > { %v2895_v23 = vpop.f32.mrf.mxu1 }
 0x900   : > { %2906 = vmatmul.mubr.msk.bf16.vlgmr.msra.gmra.mxu1 %vm1089_vm3, %v1841_v22 }
 0x901   : > { %2916 = vmatpush3.bf16.xpose.msra.mxu1 %v1949_v26  ;;  %v1790_v27 = vpop.f32.mrf.mxu1  ;;  %2917 = vmatprep.mubr.msk.bf16.mxu1 %vm3283_vm1, %v3282_v7 }
 0x902   : > { %2927 = vmatprep.subr.bf16.mxu1 %v3282_v7 }
 0x903   : > { %v2896_v29 = vpop.f32.mrf.mxu1 }
 0x908   : > { %2918 = vmatmul.mubr.msk.bf16.vlgmr.msra.gmra.mxu1 %vm1089_vm3, %v1942_v30 }
 0x909   : > { %2929 = vmatprep.mubr.msk.bf16.mxu1 %vm3283_vm1, %v3282_v7 }
 0x97e   : > { %v1993_v32 = vpop.xlane.xlu0 %1992 }
 0x97f   : > { %v1997_v34 = vsub.f32 %v1935_v15, %v1993_v32 }
 0x981   : > { %v1999_v36 = vmul.f32 1.442695, %v1997_v34 }
 0x983   : > { %3078 = vpow2.f32 %v1999_v36 }
 0x990   : > { %v3079_v37 = vpop.eup %3078 }
 0x991   : > { %v2003_v38 = vsel %vm1089_vm3, %v3079_v37, 0.0 }
 0x992   : > { %2004 = vadd.xlane.f32.xlu0 %v2003_v38 }
 0x9c0   : > { %v1882_v40 = vpop.f32.mrf.mxu1 }
 0x9c1   : > { %v1889_v41 = vadd.f32 %v1882_v40, %v1615_v39 }
 0x9c2   : > { %v2907_v42 = vpop.f32.mrf.mxu1 }
 0x9c3   : > { %v3050_v42 = vld [vmem:[%s3622_s14 + $0x18] sm:$0xff]  }
 0x9c4   : > { %v1885_v47 = vpop.f32.mrf.mxu1 }
 0x9c5   : > { %v1890_v31 = vadd.f32 %v1885_v47, %v1618_v46 }
 0x9c6   : > { %v2908_v48 = vpop.f32.mrf.mxu1 }
 0x9c8   : > { %v1985_v35 = vpop.f32.mrf.mxu1 }
 0x9c9   : > { %v1994_v49 = vsel %vm1089_vm3, %v1985_v35, -inf }
 0x9ca   : > { %1995 = vmax.xlane.f32.xlu1 %v1994_v49  ;;  %v2919_v50 = vpop.f32.mrf.mxu1 }
 0x9cc   : > { %v1988_v51 = vpop.f32.mrf.mxu1 }
 0x9ce   : > { %v2920_v52 = vpop.f32.mrf.mxu1 }
 0x9cf   : > { %v2714_v52 = vld [vmem:[%s4048_s19] ss:$0 sm:$0xff] }
 0x9db   : > { %2063 = vrot.lane.b32.xlu1 %v3711_v44, %s3286_s24 }
 0xa1b   : > { %v2005_v56 = vpop.xlane.xlu0 %2004 }
 0xa53   : > { %v1996_v25 = vpop.xlane.xlu1 %1995 }
 0xa54   : > { %v1998_v45 = vsub.f32 %v1985_v35, %v1996_v25 }
 0xa56   : > { %v2001_v53 = vmul.f32 1.442695, %v1998_v45 }
 0xa57   : > { %v2064_v54 = vpop.permute.xlu1 %2063 }
 0xa58   : > { %3080 = vpow2.f32 %v2001_v53  ;;  %v2069_v28 = vsel %vm1209_vm4, %v2064_v54, 0  ;;  %v2715_v54 = vld [vmem:[%s4050_s26] ss:$0 sm:$0xff] }
 0xa59   : > { %2928 = vmatpush3.bf16.msra.mxu1 %v2069_v28  ;;  %3082 = vrcp.f32 %v2005_v56 }
 0xa5a   : > { %2939 = vmatprep.subr.bf16.mxu1 %v3282_v7 }
 0xa65   : > { %v3081_v24 = vpop.eup %3080 }
 0xa66   : > { %v2006_v55 = vsel %vm1089_vm3, %v3081_v24, 0.0  ;;  %v3083_v44 = vpop.eup %3082 }
 0xa67   : > { %2007 = vadd.xlane.f32.xlu0 %v2006_v55  ;;  %v2011_v58 = vmul.f32 %v3083_v44, %v3079_v37  ;;  %v3051_v44 = vld [vmem:[%s3622_s14 + $0x10] sm:$0xff]  }
 0xa69   : > { %v2013_v61 = vpack.c.bf16 %v2011_v58, %v2011_v58  ;;  %v3053_v58 = vld [vmem:[%s3622_s14] sm:$0xff]  }
 0xa7d   : > { %2015 = vrot.lane.b32.xlu0 %v3709_v43, %s3286_s24 }
 0xaf0   : > { %v2008_v57 = vpop.xlane.xlu0 %2007 }
 0xaf1   : > { %3084 = vrcp.f32 %v2008_v57  ;;  %v3052_v57 = vld [vmem:[%s3622_s14 + $0x8] sm:$0xff]  }
 0xaf4   : > { %v2016_v59 = vpop.permute.xlu0 %2015 }
 0xaf5   : > { %v2021_v60 = vsel %vm1209_vm4, %v2016_v59, 0  ;;  %v2716_v59 = vld [vmem:[%s851_s20] ss:$0 sm:$0xff] }
 0xaf6   : > { %2922 = vmatpush3.bf16.msra.mxu0 %v2021_v60 }
 0xaf7   : > { %2933 = vmatprep.subr.bf16.mxu0 %v3282_v7 }
 0xaf9   : > { %2924 = vmatmul.mubr.msk.bf16.vlgmr.msra.gmra.mxu0 %vm1089_vm3, %v2013_v61 }
 0xafa   : > { %2935 = vmatprep.mubr.msk.bf16.mxu0 %vm3283_vm1, %v3282_v7  ;;  %2934 = vmatpush3.bf16.msra.mxu0 %v2116_v1 }
 0xafb   : > { %2947 = vmatprep.subr.bf16.mxu0 %v3282_v7 }
 0xafe   : > { %v3085_v43 = vpop.eup %3084 }
 0xaff   : > { %v2012_v62 = vmul.f32 %v3085_v43, %v3081_v24 }
 0xb01   : > { %v2014_v63 = vpack.c.bf16 %v2012_v62, %v2012_v62 }
 0xb03   : > { %2930 = vmatmul.mubr.msk.bf16.vlgmr.msra.gmra.mxu1 %vm1089_vm3, %v2014_v63 }
 0xb04   : > { %2943 = vmatprep.mubr.msk.bf16.mxu1 %vm3283_vm1, %v3282_v7 }
 0xbb9   : > { %v2057_v2 = vpop.f32.mrf.mxu0 }
 0xbbb   : > { %v2925_v3 = vpop.f32.mrf.mxu0 }
 0xbbd   : > { %v2060_v4 = vpop.f32.mrf.mxu0 }
 0xbbf   : > { %v2926_v5 = vpop.f32.mrf.mxu0 }
 0xbc3   : > { %v2105_v6 = vpop.f32.mrf.mxu1 }
 0xbc4   : > { %v2111_v33 = vpack.c.bf16 %v2105_v6, %v2057_v2 }
 0xbc5   : > { %v2931_v8 = vpop.f32.mrf.mxu1 }
 0xbc6   : > { %2936 = vmatmul.mubr.msk.bf16.vlgmr.msra.gmra.mxu0 %vm1089_vm3, %v2111_v33 }
 0xbc7   : > { %v2108_v11 = vpop.f32.mrf.mxu1  ;;  %2955 = vmatprep.mubr.msk.bf16.mxu0 %vm3283_vm1, %v3282_v7  ;;  %2948 = vmatpush3.bf16.msra.mxu0 %v3050_v42 }
 0xbc8   : > { %2949 = vmatprep.subr.bf16.mxu0 %v3282_v7 }
 0xbc9   : > { %v2932_v12 = vpop.f32.mrf.mxu1 }
 0xbcb   : > { %2950 = vmatpush3.bf16.msra.mxu0 %v3051_v44 }
 0xbcc   : > { %2951 = vmatprep.subr.bf16.mxu0 %v3282_v7 }
 0xbcf   : > { %2952 = vmatpush3.bf16.msra.mxu0 %v3052_v57 }
 0xbd0   : > { %2953 = vmatprep.subr.bf16.mxu0 %v3282_v7 }
 0xbd3   : > { %2954 = vmatpush3.bf16.msra.mxu0 %v3053_v58 }
 0xc86   : > { %v2152_v13 = vpop.f32.mrf.mxu0 }
 0xc87   : > { %v2159_v15 = vadd.f32 %v2152_v13, %v1889_v41  ;;  %v3049_v41 = vld [vmem:[%s713_s12] sm:$0xff]  }
 0xc88   : > { %v2937_v16 = vpop.f32.mrf.mxu0 }
 0xc89   : > { %v2168_v17 = vadd.f32 %v2713_v14, %v2159_v15 }
 0xc8a   : > { %v2155_v18 = vpop.f32.mrf.mxu0 }
 0xc8b   : > { %v2160_v19 = vadd.f32 %v2155_v18, %v1890_v31  ;;  %v2170_v20 = vadd.f32 %v2168_v17, %v3643_v9 }
 0xc8c   : > { %v2938_v21 = vpop.f32.mrf.mxu0 }
 0xc8d   : > { %v2169_v22 = vadd.f32 %v2713_v14, %v2160_v19  ;;  %v2174_v23 = vsel %vm906_vm2, %v2170_v20, 0.0 }
 0xc8e   : > { %2175 = vadd.xlane.f32.xlu1 %v2174_v23 }
 0xc8f   : > { %v2171_v26 = vadd.f32 %v2169_v22, %v3645_v10  ;;  %v3048_v10 = vld [vmem:[%s713_s12 + $0x8] sm:$0xff]  }
 0xc90   : > { %2940 = vmatpush3.bf16.msra.mxu1 %v3048_v10 }
 0xc91   : > { %v2177_v27 = vsel %vm906_vm2, %v2171_v26, 0.0  ;;  %2941 = vmatprep.subr.bf16.mxu1 %v3282_v7  ;;  %v2720_v7 = vld [vmem:[%s859_s9] ss:$0 sm:$0xff] }
 0xc92   : > { %2178 = vadd.xlane.f32.xlu0 %v2177_v27 }
 0xc94   : > { %2942 = vmatpush3.bf16.msra.mxu1 %v3049_v41 }
 0xd17   : > { %v2176_v29 = vpop.xlane.xlu1 %2175 }
 0xd18   : > { %v2181_v30 = vmul.f32 0.03125, %v2176_v29 }
 0xd1a   : > { %v2183_v32 = vsub.f32 %v2170_v20, %v2181_v30 }
 0xd1b   : > { %v2179_v34 = vpop.xlane.xlu0 %2178 }
 0xd1c   : > { %v2182_v36 = vmul.f32 0.03125, %v2179_v34  ;;  %v2185_v37 = vmul.f32 %v2183_v32, %v2183_v32 }
 0xd1e   : > { %v2184_v9 = vsub.f32 %v2171_v26, %v2182_v36  ;;  %v2187_v38 = vsel %vm906_vm2, %v2185_v37, 0.0 }
 0xd1f   : > { %2188 = vadd.xlane.f32.xlu0 %v2187_v38  ;;  %v2726_v38 = vld [vmem:[%s862_s4] ss:$0 sm:$0xff]  ;;  %s3202_s4 = scalar_lea.vmem %s2427_s29, 256 }
 0xd20   : > { %v2186_v39 = vmul.f32 %v2184_v9, %v2184_v9  ;;  %p3203_p6 = scmp.ne.s32.totalorder %s2427_s29, %s3202_s4  ;;  %p3210_p9 = scmp.lt.s32.totalorder %s3202_s4, %s3202_s4 }
 0xd22   : > { %v2190_v40 = vsel %vm906_vm2, %v2186_v39, 0.0  ;;  %p3204_p7 = pnand %p3203_p6, %p2994_p3  ;;  %p3211_p5 = por %p3210_p9, %p3209_p4 }
 0xd23   : > { %2191 = vadd.xlane.f32.xlu1 %v2190_v40  ;;  %v2727_v40 = vld [vmem:[%s865_s1] ss:$0 sm:$0xff] }
 0xd24   : > { %p3205_p11 = pneg %p3204_p7 }
 0xd26   : > { %p3212_p2 = pnand %p3211_p5, %p3205_p11 }
 0xda8   : > { %v2189_v46 = vpop.xlane.xlu0 %2188 }
 0xda9   : > { %v2193_v47 = vmul.f32 0.03125, %v2189_v46 }
 0xdab   : > { %v2195_v31 = vadd.f32 1e-05, %v2193_v47 }
 0xdac   : > { %v2192_v48 = vpop.xlane.xlu1 %2191 }
 0xdad   : > { %3086 = vrsqrt.f32 %v2195_v31  ;;  %v2194_v35 = vmul.f32 0.03125, %v2192_v48 }
 0xdaf   : > { %v2196_v49 = vadd.f32 1e-05, %v2194_v35 }
 0xdb1   : > { %3088 = vrsqrt.f32 %v2196_v49 }
 0xdba   : > { %v3087_v50 = vpop.eup %3086 }
 0xdbb   : > { %v2199_v51 = vmul.f32 %v3087_v50, %v2183_v32 }
 0xdbd   : > { %v2207_v53 = vmul.f32 %v2714_v52, %v2199_v51 }
 0xdbe   : > { %v3089_v25 = vpop.eup %3088 }
 0xdbf   : > { %v2200_v45 = vmul.f32 %v3089_v25, %v2184_v9  ;;  %v2215_v24 = vadd.f32 %v2715_v54, %v2207_v53 }
 0xdc1   : > { %v2208_v28 = vmul.f32 %v2714_v52, %v2200_v45 }
 0xdc3   : > { %v2216_v55 = vadd.f32 %v2715_v54, %v2208_v28 }
 0xdc5   : > { %v2217_v56 = vpack.c.bf16 %v2216_v55, %v2215_v24 }
 0xdc7   : > { %2944 = vmatmul.mubr.msk.bf16.vlgmr.msra.gmra.mxu1 %vm906_vm2, %v2217_v56 }
 0xe87   : > { %v2278_v60 = vpop.f32.mrf.mxu1 }
 0xe88   : > { %v2279_v43 = vadd.f32 %v2716_v59, %v2278_v60 }
 0xe89   : > { %v2945_v61 = vpop.f32.mrf.mxu1 }
 0xe8a   : > { %v2285_v1 = vmax.f32 %v2279_v43, 0.0 }
 0xe8b   : > { %v2281_v62 = vpop.f32.mrf.mxu1 }
 0xe8c   : > { %v2282_v63 = vadd.f32 %v2716_v59, %v2281_v62 }
 0xe8d   : > { %v2946_v0 = vpop.f32.mrf.mxu1 }
 0xe8e   : > { %v2286_v2 = vmax.f32 %v2282_v63, 0.0 }
 0xe90   : > { %v2287_v3 = vpack.c.bf16 %v2286_v2, %v2285_v1 }
 0xe92   : > { %2956 = vmatmul.mubr.msk.bf16.vlgmr.msra.gmra.mxu0 %vm2327_vm5, %v2287_v3 }
 0xf52   : > { %v2365_v4 = vpop.f32.mrf.mxu0 }
 0xf53   : > { %v2366_v5 = vadd.f32 %v2720_v7, %v2365_v4 }
 0xf54   : > { %v2957_v6 = vpop.f32.mrf.mxu0 }
 0xf55   : > { %v2372_v33 = vadd.f32 %v2366_v5, %v2215_v24 }
 0xf56   : > { %v2368_v8 = vpop.f32.mrf.mxu0 }
 0xf57   : > { %v2369_v11 = vadd.f32 %v2720_v7, %v2368_v8  ;;  %v2376_v12 = vsel %vm906_vm2, %v2372_v33, 0.0 }
 0xf58   : > { %2377 = vadd.xlane.f32.xlu0 %v2376_v12  ;;  %v2958_v13 = vpop.f32.mrf.mxu0 }
 0xf59   : > { %v2373_v14 = vadd.f32 %v2369_v11, %v2216_v55 }
 0xf5b   : > { %v2379_v15 = vsel %vm906_vm2, %v2373_v14, 0.0 }
 0xf5c   : > { %2380 = vadd.xlane.f32.xlu1 %v2379_v15 }
 0xfe1   : > { %v2378_v16 = vpop.xlane.xlu0 %2377 }
 0xfe2   : > { %v2382_v17 = vmul.f32 0.03125, %v2378_v16 }
 0xfe4   : > { %v2384_v18 = vsub.f32 %v2372_v33, %v2382_v17 }
 0xfe5   : > { %v2381_v19 = vpop.xlane.xlu1 %2380 }
 0xfe6   : > { %v2383_v20 = vmul.f32 0.03125, %v2381_v19  ;;  %v2386_v21 = vmul.f32 %v2384_v18, %v2384_v18 }
 0xfe8   : > { %v2385_v22 = vsub.f32 %v2373_v14, %v2383_v20  ;;  %v2388_v23 = vsel %vm906_vm2, %v2386_v21, 0.0 }
 0xfe9   : > { %2389 = vadd.xlane.f32.xlu0 %v2388_v23 }
 0xfea   : > { %v2387_v26 = vmul.f32 %v2385_v22, %v2385_v22 }
 0xfec   : > { %v2391_v27 = vsel %vm906_vm2, %v2387_v26, 0.0 }
 0xfed   : > { %2392 = vadd.xlane.f32.xlu1 %v2391_v27 }
0x1072   : > { %v2390_v29 = vpop.xlane.xlu0 %2389 }
0x1073   : > { %v2394_v30 = vmul.f32 0.03125, %v2390_v29 }
0x1075   : > { %v2396_v32 = vadd.f32 1e-05, %v2394_v30 }
0x1076   : > { %v2393_v34 = vpop.xlane.xlu1 %2392 }
0x1077   : > { %3090 = vrsqrt.f32 %v2396_v32  ;;  %v2395_v36 = vmul.f32 0.03125, %v2393_v34 }
0x1079   : > { %v2397_v37 = vadd.f32 1e-05, %v2395_v36 }
0x107b   : > { %3092 = vrsqrt.f32 %v2397_v37 }
0x1084   : > { %v3091_v9 = vpop.eup %3090 }
0x1085   : > { %v2400_v39 = vmul.f32 %v3091_v9, %v2384_v18 }
0x1087   : > { %v2408_v10 = vmul.f32 %v2726_v38, %v2400_v39 }
0x1088   : > { %v3093_v41 = vpop.eup %3092 }
0x1089   : > { %v2401_v42 = vmul.f32 %v3093_v41, %v2385_v22  ;;  %v2416_v46 = vadd.f32 %v2727_v40, %v2408_v10 }
0x108b   : > { %v2409_v47 = vmul.f32 %v2726_v38, %v2401_v42  ;;  %2418 = vst.msk [vmem:[#allocation9] sm:$0xff] %vm906_vm2, %v2416_v46 }
0x108d   : > { %v2417_v31 = vadd.f32 %v2727_v40, %v2409_v47 }
0x108f   : > { %2419 = vst.msk [vmem:[#allocation9 + $0x8] sm:$0xff] %vm906_vm2, %v2417_v31 }
0x1090   : > { %3215 = shalt.err (!%p3212_p2)
}
0x1091   : > { %s3288_s27 = smov 128   ;;  %s3289_s1 = smov 8  }
0x1092   : > { %s4055_s18 = sld [smem:[#allocation33_spill]] }
0x1098   : > { %2972 = dma.vmem_to_hbm [thread:$0]  (%p2994_p3), %s2427_s29, 256, %s4055_s18, [#allocation4], %s3288_s27, %s3288_s27, %s3289_s1  }
0x1099   : > { %3255 = dma.done.wait (%p2994_p3), [#allocation4], 256  }
0x109a   : > { %3257 = vsyncadd (%p2994_p3), [#allocation4], 4294967040 }
0x109b PF: > { %s4056_s30 = sld [smem:[#allocation16_spill]] }
0x109c   : > { %s4057_s27 = sld [smem:[#allocation14_spill]] }
0x109d   : > { %s4058_s28 = sld [smem:[#allocation15_spill]] }
0x109e   : > { %s4059_s29 = sld [smem:[#allocation17_spill]] }
0x10a1   : > { %p28_p8 = scmp.ge.s32.totalorder %s4056_s30, 4  }
0x10a3   :  { %30 = sbr.rel (!%p28_p8) target bundleno = 21 (0x15), region = 193 }
0x10a8   :  { %2442 = vsyncpa [#allocation3], 1 }
0x10a9   :  { %2444 = vsyncpa [#allocation3 + $0x1], 1 }
0x10aa   :  { %2445 = vsyncpa [#allocation6], 1 }
0x10ab   :  { %2446 = vsyncpa [#allocation4], 1 }
0x10ac   :  { %2448 = vsyncpa [#allocation4 + $0x1], 1 }

</bundles_post_ra>
